<compile_context>
chip_gen: v7x
topology: tpu7x:2x2x1
jax: 0.10.0
libtpu: 0.0.40
codegen_flags: <defaults>
</compile_context>

<pallas_src>
import jax
import jax.numpy as jnp
import numpy as np
from jax.experimental import pallas as pl
from jax.experimental.pallas import tpu as pltpu


# bias rows appended at the bottom of the weight slab
ROW_WIH_F, ROW_WIH_R, ROW_BIH, ROW_BHHN = 0, 1, 2, 3
ROW_IB, ROW_PB1, ROW_PB2, ROW_PB3 = 4, 5, 6, 7
ROW_QB1, ROW_QB2, ROW_QB3, ROW_DB = 8, 9, 10, 11
N_BIAS_ROWS = 16


def _round_up(x, m):
    return (x + m - 1) // m * m


def _dot(a, w):
    return jnp.dot(a, w, preferred_element_type=jnp.float32)


def _pack_params(p, H, A, T, L, K):
    """Host-side re-packing of the PyTorch-style parameters into 2 slabs."""
    f32 = jnp.float32
    H2, H3, H4, H6 = 2 * H, 3 * H, 4 * H, 6 * H
    KL, KH = K * L, K * H

    def interleave(f, r):
        # f, r: (rows, 3H) -> (rows, 6H), gate layout [r_f r_r z_f z_r n_f n_r]
        parts = []
        for g in range(3):
            parts.append(f[:, g * H:(g + 1) * H])
            parts.append(r[:, g * H:(g + 1) * H])
        return jnp.concatenate(parts, axis=-1)

    z13 = jnp.zeros((1, H3), f32)
    zH3 = jnp.zeros((H, H3), f32)

    wih_f = interleave(p["fWih"].astype(f32), z13)                 # (1, 6H)
    wih_r = interleave(z13, p["rWih"].astype(f32))                 # (1, 6H)
    bih = interleave(p["fbih"].astype(f32), p["rbih"].astype(f32))
    bhh = interleave(p["fbhh"].astype(f32), p["rbhh"].astype(f32))
    # fold the r/z halves of b_hh into b_ih (the n-gate b_hh must stay
    # separate: PyTorch applies it inside the r * (...) term)
    bih_all = bih.at[:, :H4].add(bhh[:, :H4])                      # (1, 6H)
    bhh_n = bhh[:, H4:H6]                                          # (1, 2H)

    whh = jnp.concatenate([interleave(p["fWhh"].astype(f32), zH3),
                           interleave(zH3, p["rWhh"].astype(f32))],
                          axis=0)                                  # (2H, 6H)

    # ---- input slab lane layout ----
    OFF_ENC, OFF_EPS = 0, H
    OFF_CUR = H + KL
    OFF_TFA = OFF_CUR + A
    slab_w = _round_up(OFF_TFA + T, 128)

    # ---- fused input-side weight (enc / cur rows; tfa/eps rows stay zero) --
    O_Q1, O_DEC = 0, 128
    O_P1 = O_DEC + KH
    O_IH = O_P1 + 64
    fused_w = _round_up(O_IH + H2, 128)
    dWe = jnp.concatenate([p["dW"][:H].astype(f32)] * K, axis=1)   # (H, K*H)
    wf = jnp.zeros((slab_w, fused_w), f32)
    wf = wf.at[OFF_ENC:OFF_ENC + H, O_Q1:O_Q1 + 128].set(p["qW1"][:H].astype(f32))
    wf = wf.at[OFF_ENC:OFF_ENC + H, O_DEC:O_DEC + KH].set(dWe)
    wf = wf.at[OFF_ENC:OFF_ENC + H, O_P1:O_P1 + 64].set(p["pW1"].astype(f32))
    wf = wf.at[OFF_CUR:OFF_CUR + A, O_IH:O_IH + H].set(p["iW"].astype(f32))

    # ---- remaining weights + biases packed into one zero-padded slab -------
    mats = {
        "whh": whh,                                                        # (2H, 6H)
        "qW1fr": p["qW1"][H:].astype(f32),                                 # (2H, 128)
        "qW2": p["qW2"].astype(f32),                                       # (128, 64)
        "qW3": p["qW3"].astype(f32),                                       # (64, 2L)
        "pW2": p["pW2"].astype(f32),                                       # (64, 32)
        "pW3": p["pW3"].astype(f32),                                       # (32, 2L)
        "dWz": jnp.kron(jnp.eye(K, dtype=f32), p["dW"][H:].astype(f32)),   # (KL, KH)
    }
    row_off, r = {}, 0
    for name, m in mats.items():
        row_off[name] = r
        r += _round_up(m.shape[0], 8)
    bias_row0 = r
    n_rows = bias_row0 + N_BIAS_ROWS

    ib_row = jnp.concatenate([p["ib"].astype(f32), jnp.zeros((1, H), f32)], axis=1)
    db_rep = jnp.tile(p["db"].astype(f32), (1, K))
    bias_rows = [wih_f, wih_r, bih_all, bhh_n, ib_row,
                 p["pb1"], p["pb2"], p["pb3"],
                 p["qb1"], p["qb2"], p["qb3"], db_rep]

    ws_w = _round_up(max([m.shape[1] for m in mats.values()]
                         + [b.shape[1] for b in bias_rows] + [128]), 128)
    ws = jnp.zeros((n_rows, ws_w), f32)
    for name, m in mats.items():
        ws = ws.at[row_off[name]:row_off[name] + m.shape[0], :m.shape[1]].set(m)
    for i, b in enumerate(bias_rows):
        ws = ws.at[bias_row0 + i, :b.shape[1]].set(b[0].astype(f32))

    return {"wf": wf, "ws": ws, "slab_w": slab_w,
            "off_eps": OFF_EPS, "off_cur": OFF_CUR, "off_tfa": OFF_TFA,
            "o_q1": O_Q1, "o_dec": O_DEC, "o_p1": O_P1, "o_ih": O_IH,
            "row_off": row_off, "bias_row0": bias_row0}


def encoder_latent_cvae_k(enc_hx, cur_action, target_future_action, eps, params):
    B, H = enc_hx.shape
    A = cur_action.shape[1]
    T = target_future_action.shape[1]
    _, K, L = eps.shape
    H2, H4, H6 = 2 * H, 4 * H, 6 * H
    KL, KH = K * L, K * H
    dec_w = _round_up(KH, 128)

    pk = _pack_params(params, H, A, T, L, K)
    slab_w = pk["slab_w"]
    OFF_EPS, OFF_CUR, OFF_TFA = pk["off_eps"], pk["off_cur"], pk["off_tfa"]
    O_Q1, O_DEC, O_P1, O_IH = pk["o_q1"], pk["o_dec"], pk["o_p1"], pk["o_ih"]
    row_off, bias_row0 = pk["row_off"], pk["bias_row0"]

    # batch tiling: large tiles to amortize per-grid-step overhead, but at
    # least two blocks when B >= 16 so v7x's two TensorCores both get work.
    if B >= 16:
        tile_b = min(256, _round_up((B + 1) // 2, 8))
    else:
        tile_b = _round_up(max(B, 1), 8)
    b_pad = _round_up(B, tile_b)
    n_blk = b_pad // tile_b

    # lane-dense input slab: [enc | eps | cur | tfa | pad]
    xin = jnp.zeros((b_pad, slab_w), jnp.float32)
    xin = xin.at[:B, 0:H].set(enc_hx.astype(jnp.float32))
    xin = xin.at[:B, OFF_EPS:OFF_EPS + KL].set(eps.reshape(B, KL).astype(jnp.float32))
    xin = xin.at[:B, OFF_CUR:OFF_CUR + A].set(cur_action.astype(jnp.float32))
    xin = xin.at[:B, OFF_TFA:OFF_TFA + T].set(
        target_future_action.astype(jnp.float32))

    def kernel(xin_ref, wf_ref, ws_ref, dec_ref, kld_ref):
        xin_v = xin_ref[...]                                     # (TB, slab_w)
        tb = xin_v.shape[0]

        def brow(i, w):
            return ws_ref[bias_row0 + i:bias_row0 + i + 1, :w]   # (1, w) load

        # ---- one fused matmul for every raw-input matmul --------------------
        fused = _dot(xin_v, wf_ref[...])                         # (TB, fused_w)
        q1_pre = fused[:, O_Q1:O_Q1 + 128]                       # enc @ qW1[:H]
        dec_pre = fused[:, O_DEC:O_DEC + KH]                     # enc @ dWe (K-tiled)
        p1_pre = fused[:, O_P1:O_P1 + 64]                        # enc @ pW1
        ih_pre = fused[:, O_IH:O_IH + H2]                        # [cur @ iW | 0]

        # ---- p_z_x(enc_hx) ---------------------------------------------------
        h = jnp.maximum(p1_pre + brow(ROW_PB1, 64), 0.0)
        h = jnp.maximum(_dot(h, ws_ref[row_off["pW2"]:row_off["pW2"] + 64, :32])
                        + brow(ROW_PB2, 32), 0.0)
        mlv_p = (_dot(h, ws_ref[row_off["pW3"]:row_off["pW3"] + 32, :2 * L])
                 + brow(ROW_PB3, 2 * L))
        mu_p, lv_p = mlv_p[:, :L], mlv_p[:, L:]

        # ---- bidirectional GRU, both directions fused in one state ----------
        hcat = jnp.maximum(ih_pre + brow(ROW_IB, H2), 0.0)       # [h_f | h_r=0]

        whh = ws_ref[row_off["whh"]:row_off["whh"] + H2, :H6]    # (2H, 6H)
        wih_f = brow(ROW_WIH_F, H6)
        wih_r = brow(ROW_WIH_R, H6)
        # hoisted bias broadcasts (r/z b_hh already folded into b_ih host-side)
        bih_b = jnp.broadcast_to(brow(ROW_BIH, H6), (tb, H6))
        bhhn_b = jnp.broadcast_to(brow(ROW_BHHN, H2), (tb, H2))

        # statically unrolled recurrence; gi is built inside the loop so only
        # hcat (and the hoisted biases) stays live across steps.
        for t in range(T):
            gh = _dot(hcat, whh)                                 # (TB, 6H)
            tf = xin_v[:, OFF_TFA + t:OFF_TFA + t + 1]
            tr = xin_v[:, OFF_TFA + T - 1 - t:OFF_TFA + T - t]
            gi = tf * wih_f + tr * wih_r + bih_b                 # hides under MXU drain
            rz = jax.nn.sigmoid(gi[:, :H4] + gh[:, :H4])         # [r_f r_r z_f z_r]
            r_g = rz[:, :H2]
            z_g = rz[:, H2:H4]
            n_g = jnp.tanh(gi[:, H4:H6] + r_g * (gh[:, H4:H6] + bhhn_b))
            hcat = (1.0 - z_g) * n_g + z_g * hcat

        # ---- q_z_xy([enc, h_f, h_r]) as summed partial matmuls --------------
        q = jnp.maximum(
            q1_pre
            + _dot(hcat, ws_ref[row_off["qW1fr"]:row_off["qW1fr"] + H2, :128])
            + brow(ROW_QB1, 128), 0.0)
        q = jnp.maximum(_dot(q, ws_ref[row_off["qW2"]:row_off["qW2"] + 128, :64])
                        + brow(ROW_QB2, 64), 0.0)
        mlv_q = (_dot(q, ws_ref[row_off["qW3"]:row_off["qW3"] + 64, :2 * L])
                 + brow(ROW_QB3, 2 * L))
        mu_q, lv_q = mlv_q[:, :L], mlv_q[:, L:]

        # ---- per-row KLD partial (batch mean + clamp done in the wrapper) ---
        inv_var_p = jnp.exp(-lv_p)
        kld_el = 0.5 * (jnp.exp(lv_q) * inv_var_p
                        + (mu_p - mu_q) ** 2 * inv_var_p
                        - 1.0 + (lv_p - lv_q))
        kld_ref[...] = jnp.sum(kld_el, axis=-1, keepdims=True)

        # ---- reparameterize K samples + decoder input, lane-dense output ----
        eps_v = xin_v[:, OFF_EPS:OFF_EPS + KL]
        std_q = jnp.exp(0.5 * lv_q)
        mu_t = jnp.concatenate([mu_q] * K, axis=-1)              # (TB, K*L)
        std_t = jnp.concatenate([std_q] * K, axis=-1)
        z_t = mu_t + eps_v * std_t
        dec = jnp.maximum(
            dec_pre
            + _dot(z_t, ws_ref[row_off["dWz"]:row_off["dWz"] + KL, :KH])
            + brow(ROW_DB, KH), 0.0)                             # (TB, K*H)
        if dec_w > KH:  # keep the store lane-dense / unmasked for any config
            dec = jnp.concatenate(
                [dec, jnp.zeros((tb, dec_w - KH), jnp.float32)], axis=-1)
        dec_ref[...] = dec.astype(dec_ref.dtype)

    def const_spec(shape):
        return pl.BlockSpec(shape, lambda i: (0, 0))

    grid_spec = pltpu.PrefetchScalarGridSpec(
        num_scalar_prefetch=0,
        grid=(n_blk,),
        in_specs=[pl.BlockSpec((tile_b, slab_w), lambda i: (i, 0)),
                  const_spec(pk["wf"].shape),
                  const_spec(pk["ws"].shape)],
        out_specs=(pl.BlockSpec((tile_b, dec_w), lambda i: (i, 0)),
                   pl.BlockSpec((tile_b, 1), lambda i: (i, 0))),
    )

    dec_flat, kld_rows = pl.pallas_call(
        kernel,
        out_shape=(jax.ShapeDtypeStruct((b_pad, dec_w), jnp.float32),
                   jax.ShapeDtypeStruct((b_pad, 1), jnp.float32)),
        grid_spec=grid_spec,
        compiler_params=pltpu.CompilerParams(
            dimension_semantics=("parallel",)),
    )(xin, pk["wf"], pk["ws"])

    dec = dec_flat[:B, :KH].reshape(B, K, H)
    kld = jnp.maximum(jnp.sum(kld_rows[:B]) / B, 0.001)
    return dec, kld


def build_params(key, H, A, L):
    keys = iter(jax.random.split(key, 64))

    def lin(fin, fout):
        w = jax.random.normal(next(keys), (fin, fout), jnp.float32) / np.sqrt(fin)
        b = jax.random.normal(next(keys), (1, fout), jnp.float32) * 0.01
        return w, b

    p = {}
    p["pW1"], p["pb1"] = lin(H, 64)
    p["pW2"], p["pb2"] = lin(64, 32)
    p["pW3"], p["pb3"] = lin(32, 2 * L)
    p["iW"], p["ib"] = lin(A, H)
    for d in ("f", "r"):  # forward / reverse GRU directions
        p[f"{d}Wih"] = jax.random.normal(next(keys), (1, 3 * H), jnp.float32) / np.sqrt(H)
        p[f"{d}Whh"] = jax.random.normal(next(keys), (H, 3 * H), jnp.float32) / np.sqrt(H)
        p[f"{d}bih"] = jax.random.normal(next(keys), (1, 3 * H), jnp.float32) * 0.01
        p[f"{d}bhh"] = jax.random.normal(next(keys), (1, 3 * H), jnp.float32) * 0.01
    p["qW1"], p["qb1"] = lin(3 * H, 128)
    p["qW2"], p["qb2"] = lin(128, 64)
    p["qW3"], p["qb3"] = lin(64, 2 * L)
    p["dW"], p["db"] = lin(H + L, H)
    return p


def reference(enc_hx, cur_action, tfa, eps, p):
    """Pure-JAX reference mirroring the PyTorch forward (same params/eps)."""
    relu = lambda x: jnp.maximum(x, 0.0)
    B, H = enc_hx.shape
    L = eps.shape[-1]
    T = tfa.shape[1]
    K = eps.shape[1]

    h = relu(enc_hx @ p["pW1"] + p["pb1"])
    h = relu(h @ p["pW2"] + p["pb2"])
    mlv_p = h @ p["pW3"] + p["pb3"]
    mu_p, lv_p = mlv_p[:, :L], mlv_p[:, L:]

    h_f = relu(cur_action @ p["iW"] + p["ib"])
    h_r = jnp.zeros_like(h_f)
    x = tfa.astype(jnp.float32)

    def cell(xt, hprev, d):
        gi = xt[:, None] * p[f"{d}Wih"] + p[f"{d}bih"]
        gh = hprev @ p[f"{d}Whh"] + p[f"{d}bhh"]
        r = jax.nn.sigmoid(gi[:, :H] + gh[:, :H])
        z = jax.nn.sigmoid(gi[:, H:2 * H] + gh[:, H:2 * H])
        n = jnp.tanh(gi[:, 2 * H:] + r * gh[:, 2 * H:])
        return (1.0 - z) * n + z * hprev

    for t in range(T):
        h_f = cell(x[:, t], h_f, "f")
        h_r = cell(x[:, T - 1 - t], h_r, "r")

    tah = jnp.concatenate([h_f, h_r], axis=-1)
    q = jnp.concatenate([enc_hx, tah], axis=-1)
    q = relu(q @ p["qW1"] + p["qb1"])
    q = relu(q @ p["qW2"] + p["qb2"])
    mlv_q = q @ p["qW3"] + p["qb3"]
    mu_q, lv_q = mlv_q[:, :L], mlv_q[:, L:]

    kld = 0.5 * (jnp.exp(lv_q) / jnp.exp(lv_p)
                 + (mu_p - mu_q) ** 2 / jnp.exp(lv_p)
                 - 1.0 + (lv_p - lv_q))
    kld = jnp.maximum(kld.sum(-1).mean(), 0.001)

    std = jnp.exp(0.5 * lv_q)
    Z = mu_q[:, None, :] + eps * std[:, None, :]
    enc_rep = jnp.broadcast_to(enc_hx[:, None, :], (B, K, H))
    d_in = jnp.concatenate([enc_rep, Z], axis=-1)
    dec = relu(d_in @ p["dW"] + p["db"])
    return dec, kld


if __name__ == "__main__":
    # small shapes consistent with the module:
    #   hidden_size=32, latent_dim=8, NUM_ACTION=6, K=4, batch=2, future_len=8
    B, H, L, A, K, T = 2, 32, 8, 6, 4, 8

    key = jax.random.PRNGKey(0)
    k1, k2, k3, k4, kp = jax.random.split(key, 5)
    enc_hx = jax.random.normal(k1, (B, H), jnp.float32)
    cur_action = jax.random.normal(k2, (B, A), jnp.float32)
    target_future_action = jax.random.randint(k3, (B, T), 0, A).astype(jnp.float32)
    # TODO(synk): torch.normal(mean=0, std=1.5) RNG is drawn host-side with
    # jax.random (statistically equivalent), not with the in-kernel TPU PRNG.
    eps = jax.random.normal(k4, (B, K, L), jnp.float32) * 1.5

    params = build_params(kp, H, A, L)

    dec, kld = encoder_latent_cvae_k(enc_hx, cur_action, target_future_action,
                                     eps, params)
    jax.block_until_ready(dec)
    jax.block_until_ready(kld)

    dec_ref, kld_ref = reference(enc_hx, cur_action, target_future_action, eps, params)
    np.testing.assert_allclose(np.asarray(dec), np.asarray(dec_ref),
                               rtol=2e-2, atol=2e-2)
    np.testing.assert_allclose(float(kld), float(kld_ref), rtol=2e-2, atol=2e-2)
    assert dec.shape == (B, K, H)
    print("KERNEL_OK")
</pallas_src>

<mosaic_0001>
module attributes {stable_mosaic.version = 11 : i64} {
  func.func @kernel(%arg0: i32, %arg1: memref<8x128xf32, #tpu.memory_space<vmem>>, %arg2: memref<128x384xf32, #tpu.memory_space<vmem>>, %arg3: memref<464x256xf32, #tpu.memory_space<vmem>>, %arg4: memref<8x128xf32, #tpu.memory_space<vmem>>, %arg5: memref<8x1xf32, #tpu.memory_space<vmem>>) attributes {dimension_semantics = [#tpu.dimension_semantics<parallel>], iteration_bounds = array<i64: 1>, scalar_prefetch = 0 : i64, scratch_operands = 0 : i64, tpu.core_type = #tpu.core_type<tc>, window_params = [{transform_indices = @transform_0, window_bounds = array<i64: 8, 128>}, {pipeline_mode = #tpu.pipeline_mode<synchronous>, transform_indices = @transform_1, window_bounds = array<i64: 128, 384>}, {pipeline_mode = #tpu.pipeline_mode<synchronous>, transform_indices = @transform_2, window_bounds = array<i64: 464, 256>}, {transform_indices = @transform_3, window_bounds = array<i64: 8, 128>}, {transform_indices = @transform_4, window_bounds = array<i64: 8, 1>}]} {
    %c0 = arith.constant 0 : index
    %c0_0 = arith.constant 0 : index
    %0 = vector.load %arg1[%c0, %c0_0] : memref<8x128xf32, #tpu.memory_space<vmem>>, vector<8x128xf32>
    %c0_1 = arith.constant 0 : index
    %c0_2 = arith.constant 0 : index
    %1 = vector.load %arg2[%c0_1, %c0_2] : memref<128x384xf32, #tpu.memory_space<vmem>>, vector<128x384xf32>
    %cst = arith.constant dense<0.000000e+00> : vector<8x384xf32>
    %2 = tpu.matmul %0, %1, %cst {dimension_numbers = #tpu.dot_dimension_numbers<[1], [0], [0], [1], [0, 0, 1, 1], [], []>} : vector<8x128xf32>, vector<128x384xf32>, vector<8x384xf32> -> vector<8x384xf32>
    %3 = vector.extract_strided_slice %2 {offsets = [0, 0], sizes = [8, 128], strides = [1, 1]} : vector<8x384xf32> to vector<8x128xf32>
    %4 = vector.extract_strided_slice %2 {offsets = [0, 128], sizes = [8, 128], strides = [1, 1]} : vector<8x384xf32> to vector<8x128xf32>
    %5 = vector.extract_strided_slice %2 {offsets = [0, 256], sizes = [8, 64], strides = [1, 1]} : vector<8x384xf32> to vector<8x64xf32>
    %6 = vector.extract_strided_slice %2 {offsets = [0, 320], sizes = [8, 64], strides = [1, 1]} : vector<8x384xf32> to vector<8x64xf32>
    %c453 = arith.constant 453 : index
    %c0_3 = arith.constant 0 : index
    %7 = vector.load %arg3[%c453, %c0_3] : memref<464x256xf32, #tpu.memory_space<vmem>>, vector<1x64xf32>
    %8 = vector.broadcast %7 : vector<1x64xf32> to vector<8x64xf32>
    %9 = arith.addf %5, %8 : vector<8x64xf32>
    %cst_4 = arith.constant 0.000000e+00 : f32
    %10 = vector.broadcast %cst_4 : f32 to vector<8x64xf32>
    %11 = arith.maximumf %9, %10 : vector<8x64xf32>
    %c320 = arith.constant 320 : index
    %c0_5 = arith.constant 0 : index
    %12 = vector.load %arg3[%c320, %c0_5] : memref<464x256xf32, #tpu.memory_space<vmem>>, vector<64x32xf32>
    %cst_6 = arith.constant dense<0.000000e+00> : vector<8x32xf32>
    %13 = tpu.matmul %11, %12, %cst_6 {dimension_numbers = #tpu.dot_dimension_numbers<[1], [0], [0], [1], [0, 0, 1, 1], [], []>} : vector<8x64xf32>, vector<64x32xf32>, vector<8x32xf32> -> vector<8x32xf32>
    %c454 = arith.constant 454 : index
    %c0_7 = arith.constant 0 : index
    %14 = vector.load %arg3[%c454, %c0_7] : memref<464x256xf32, #tpu.memory_space<vmem>>, vector<1x32xf32>
    %15 = vector.broadcast %14 : vector<1x32xf32> to vector<8x32xf32>
    %16 = arith.addf %13, %15 : vector<8x32xf32>
    %cst_8 = arith.constant 0.000000e+00 : f32
    %17 = vector.broadcast %cst_8 : f32 to vector<8x32xf32>
    %18 = arith.maximumf %16, %17 : vector<8x32xf32>
    %c384 = arith.constant 384 : index
    %c0_9 = arith.constant 0 : index
    %19 = vector.load %arg3[%c384, %c0_9] : memref<464x256xf32, #tpu.memory_space<vmem>>, vector<32x16xf32>
    %cst_10 = arith.constant dense<0.000000e+00> : vector<8x16xf32>
    %20 = tpu.matmul %18, %19, %cst_10 {dimension_numbers = #tpu.dot_dimension_numbers<[1], [0], [0], [1], [0, 0, 1, 1], [], []>} : vector<8x32xf32>, vector<32x16xf32>, vector<8x16xf32> -> vector<8x16xf32>
    %c455 = arith.constant 455 : index
    %c0_11 = arith.constant 0 : index
    %21 = vector.load %arg3[%c455, %c0_11] : memref<464x256xf32, #tpu.memory_space<vmem>>, vector<1x16xf32>
    %22 = vector.broadcast %21 : vector<1x16xf32> to vector<8x16xf32>
    %23 = arith.addf %20, %22 : vector<8x16xf32>
    %24 = vector.extract_strided_slice %23 {offsets = [0, 0], sizes = [8, 8], strides = [1, 1]} : vector<8x16xf32> to vector<8x8xf32>
    %25 = vector.extract_strided_slice %23 {offsets = [0, 8], sizes = [8, 8], strides = [1, 1]} : vector<8x16xf32> to vector<8x8xf32>
    %c452 = arith.constant 452 : index
    %c0_12 = arith.constant 0 : index
    %26 = vector.load %arg3[%c452, %c0_12] : memref<464x256xf32, #tpu.memory_space<vmem>>, vector<1x64xf32>
    %27 = vector.broadcast %26 : vector<1x64xf32> to vector<8x64xf32>
    %28 = arith.addf %6, %27 : vector<8x64xf32>
    %cst_13 = arith.constant 0.000000e+00 : f32
    %29 = vector.broadcast %cst_13 : f32 to vector<8x64xf32>
    %30 = arith.maximumf %28, %29 : vector<8x64xf32>
    %c0_14 = arith.constant 0 : index
    %c0_15 = arith.constant 0 : index
    %31 = vector.load %arg3[%c0_14, %c0_15] : memref<464x256xf32, #tpu.memory_space<vmem>>, vector<64x192xf32>
    %c448 = arith.constant 448 : index
    %c0_16 = arith.constant 0 : index
    %32 = vector.load %arg3[%c448, %c0_16] : memref<464x256xf32, #tpu.memory_space<vmem>>, vector<1x192xf32>
    %c449 = arith.constant 449 : index
    %c0_17 = arith.constant 0 : index
    %33 = vector.load %arg3[%c449, %c0_17] : memref<464x256xf32, #tpu.memory_space<vmem>>, vector<1x192xf32>
    %c450 = arith.constant 450 : index
    %c0_18 = arith.constant 0 : index
    %34 = vector.load %arg3[%c450, %c0_18] : memref<464x256xf32, #tpu.memory_space<vmem>>, vector<1x192xf32>
    %35 = vector.shape_cast %34 : vector<1x192xf32> to vector<1x192xf32>
    %36 = vector.broadcast %35 : vector<1x192xf32> to vector<8x192xf32>
    %c451 = arith.constant 451 : index
    %c0_19 = arith.constant 0 : index
    %37 = vector.load %arg3[%c451, %c0_19] : memref<464x256xf32, #tpu.memory_space<vmem>>, vector<1x64xf32>
    %38 = vector.shape_cast %37 : vector<1x64xf32> to vector<1x64xf32>
    %39 = vector.broadcast %38 : vector<1x64xf32> to vector<8x64xf32>
    %cst_20 = arith.constant dense<0.000000e+00> : vector<8x192xf32>
    %40 = tpu.matmul %30, %31, %cst_20 {dimension_numbers = #tpu.dot_dimension_numbers<[1], [0], [0], [1], [0, 0, 1, 1], [], []>} : vector<8x64xf32>, vector<64x192xf32>, vector<8x192xf32> -> vector<8x192xf32>
    %41 = vector.extract_strided_slice %0 {offsets = [0, 70], sizes = [8, 1], strides = [1, 1]} : vector<8x128xf32> to vector<8x1xf32>
    %42 = vector.extract_strided_slice %0 {offsets = [0, 77], sizes = [8, 1], strides = [1, 1]} : vector<8x128xf32> to vector<8x1xf32>
    %43 = vector.broadcast %41 : vector<8x1xf32> to vector<8x192xf32>
    %44 = vector.broadcast %32 : vector<1x192xf32> to vector<8x192xf32>
    %45 = arith.mulf %43, %44 : vector<8x192xf32>
    %46 = vector.broadcast %42 : vector<8x1xf32> to vector<8x192xf32>
    %47 = vector.broadcast %33 : vector<1x192xf32> to vector<8x192xf32>
    %48 = arith.mulf %46, %47 : vector<8x192xf32>
    %49 = arith.addf %45, %48 : vector<8x192xf32>
    %50 = arith.addf %49, %36 : vector<8x192xf32>
    %51 = vector.extract_strided_slice %50 {offsets = [0, 0], sizes = [8, 128], strides = [1, 1]} : vector<8x192xf32> to vector<8x128xf32>
    %52 = vector.extract_strided_slice %40 {offsets = [0, 0], sizes = [8, 128], strides = [1, 1]} : vector<8x192xf32> to vector<8x128xf32>
    %53 = arith.addf %51, %52 : vector<8x128xf32>
    %54 = arith.negf %53 : vector<8x128xf32>
    %55 = math.exp %54 : vector<8x128xf32>
    %cst_21 = arith.constant 1.000000e+00 : f32
    %56 = vector.broadcast %cst_21 : f32 to vector<8x128xf32>
    %57 = arith.addf %56, %55 : vector<8x128xf32>
    %58 = arith.divf %56, %57 : vector<8x128xf32>
    %59 = vector.extract_strided_slice %58 {offsets = [0, 0], sizes = [8, 64], strides = [1, 1]} : vector<8x128xf32> to vector<8x64xf32>
    %60 = vector.extract_strided_slice %58 {offsets = [0, 64], sizes = [8, 64], strides = [1, 1]} : vector<8x128xf32> to vector<8x64xf32>
    %61 = vector.extract_strided_slice %50 {offsets = [0, 128], sizes = [8, 64], strides = [1, 1]} : vector<8x192xf32> to vector<8x64xf32>
    %62 = vector.extract_strided_slice %40 {offsets = [0, 128], sizes = [8, 64], strides = [1, 1]} : vector<8x192xf32> to vector<8x64xf32>
    %63 = arith.addf %62, %39 : vector<8x64xf32>
    %64 = arith.mulf %59, %63 : vector<8x64xf32>
    %65 = arith.addf %61, %64 : vector<8x64xf32>
    %66 = math.tanh %65 : vector<8x64xf32>
    %cst_22 = arith.constant 1.000000e+00 : f32
    %67 = vector.broadcast %cst_22 : f32 to vector<8x64xf32>
    %68 = arith.subf %67, %60 : vector<8x64xf32>
    %69 = arith.mulf %68, %66 : vector<8x64xf32>
    %70 = arith.mulf %60, %30 : vector<8x64xf32>
    %71 = arith.addf %69, %70 : vector<8x64xf32>
    %cst_23 = arith.constant dense<0.000000e+00> : vector<8x192xf32>
    %72 = tpu.matmul %71, %31, %cst_23 {dimension_numbers = #tpu.dot_dimension_numbers<[1], [0], [0], [1], [0, 0, 1, 1], [], []>} : vector<8x64xf32>, vector<64x192xf32>, vector<8x192xf32> -> vector<8x192xf32>
    %73 = vector.extract_strided_slice %0 {offsets = [0, 71], sizes = [8, 1], strides = [1, 1]} : vector<8x128xf32> to vector<8x1xf32>
    %74 = vector.extract_strided_slice %0 {offsets = [0, 76], sizes = [8, 1], strides = [1, 1]} : vector<8x128xf32> to vector<8x1xf32>
    %75 = vector.broadcast %73 : vector<8x1xf32> to vector<8x192xf32>
    %76 = vector.broadcast %32 : vector<1x192xf32> to vector<8x192xf32>
    %77 = arith.mulf %75, %76 : vector<8x192xf32>
    %78 = vector.broadcast %74 : vector<8x1xf32> to vector<8x192xf32>
    %79 = vector.broadcast %33 : vector<1x192xf32> to vector<8x192xf32>
    %80 = arith.mulf %78, %79 : vector<8x192xf32>
    %81 = arith.addf %77, %80 : vector<8x192xf32>
    %82 = arith.addf %81, %36 : vector<8x192xf32>
    %83 = vector.extract_strided_slice %82 {offsets = [0, 0], sizes = [8, 128], strides = [1, 1]} : vector<8x192xf32> to vector<8x128xf32>
    %84 = vector.extract_strided_slice %72 {offsets = [0, 0], sizes = [8, 128], strides = [1, 1]} : vector<8x192xf32> to vector<8x128xf32>
    %85 = arith.addf %83, %84 : vector<8x128xf32>
    %86 = arith.negf %85 : vector<8x128xf32>
    %87 = math.exp %86 : vector<8x128xf32>
    %cst_24 = arith.constant 1.000000e+00 : f32
    %88 = vector.broadcast %cst_24 : f32 to vector<8x128xf32>
    %89 = arith.addf %88, %87 : vector<8x128xf32>
    %90 = arith.divf %88, %89 : vector<8x128xf32>
    %91 = vector.extract_strided_slice %90 {offsets = [0, 0], sizes = [8, 64], strides = [1, 1]} : vector<8x128xf32> to vector<8x64xf32>
    %92 = vector.extract_strided_slice %90 {offsets = [0, 64], sizes = [8, 64], strides = [1, 1]} : vector<8x128xf32> to vector<8x64xf32>
    %93 = vector.extract_strided_slice %82 {offsets = [0, 128], sizes = [8, 64], strides = [1, 1]} : vector<8x192xf32> to vector<8x64xf32>
    %94 = vector.extract_strided_slice %72 {offsets = [0, 128], sizes = [8, 64], strides = [1, 1]} : vector<8x192xf32> to vector<8x64xf32>
    %95 = arith.addf %94, %39 : vector<8x64xf32>
    %96 = arith.mulf %91, %95 : vector<8x64xf32>
    %97 = arith.addf %93, %96 : vector<8x64xf32>
    %98 = math.tanh %97 : vector<8x64xf32>
    %cst_25 = arith.constant 1.000000e+00 : f32
    %99 = vector.broadcast %cst_25 : f32 to vector<8x64xf32>
    %100 = arith.subf %99, %92 : vector<8x64xf32>
    %101 = arith.mulf %100, %98 : vector<8x64xf32>
    %102 = arith.mulf %92, %71 : vector<8x64xf32>
    %103 = arith.addf %101, %102 : vector<8x64xf32>
    %cst_26 = arith.constant dense<0.000000e+00> : vector<8x192xf32>
    %104 = tpu.matmul %103, %31, %cst_26 {dimension_numbers = #tpu.dot_dimension_numbers<[1], [0], [0], [1], [0, 0, 1, 1], [], []>} : vector<8x64xf32>, vector<64x192xf32>, vector<8x192xf32> -> vector<8x192xf32>
    %105 = vector.extract_strided_slice %0 {offsets = [0, 72], sizes = [8, 1], strides = [1, 1]} : vector<8x128xf32> to vector<8x1xf32>
    %106 = vector.extract_strided_slice %0 {offsets = [0, 75], sizes = [8, 1], strides = [1, 1]} : vector<8x128xf32> to vector<8x1xf32>
    %107 = vector.broadcast %105 : vector<8x1xf32> to vector<8x192xf32>
    %108 = vector.broadcast %32 : vector<1x192xf32> to vector<8x192xf32>
    %109 = arith.mulf %107, %108 : vector<8x192xf32>
    %110 = vector.broadcast %106 : vector<8x1xf32> to vector<8x192xf32>
    %111 = vector.broadcast %33 : vector<1x192xf32> to vector<8x192xf32>
    %112 = arith.mulf %110, %111 : vector<8x192xf32>
    %113 = arith.addf %109, %112 : vector<8x192xf32>
    %114 = arith.addf %113, %36 : vector<8x192xf32>
    %115 = vector.extract_strided_slice %114 {offsets = [0, 0], sizes = [8, 128], strides = [1, 1]} : vector<8x192xf32> to vector<8x128xf32>
    %116 = vector.extract_strided_slice %104 {offsets = [0, 0], sizes = [8, 128], strides = [1, 1]} : vector<8x192xf32> to vector<8x128xf32>
    %117 = arith.addf %115, %116 : vector<8x128xf32>
    %118 = arith.negf %117 : vector<8x128xf32>
    %119 = math.exp %118 : vector<8x128xf32>
    %cst_27 = arith.constant 1.000000e+00 : f32
    %120 = vector.broadcast %cst_27 : f32 to vector<8x128xf32>
    %121 = arith.addf %120, %119 : vector<8x128xf32>
    %122 = arith.divf %120, %121 : vector<8x128xf32>
    %123 = vector.extract_strided_slice %122 {offsets = [0, 0], sizes = [8, 64], strides = [1, 1]} : vector<8x128xf32> to vector<8x64xf32>
    %124 = vector.extract_strided_slice %122 {offsets = [0, 64], sizes = [8, 64], strides = [1, 1]} : vector<8x128xf32> to vector<8x64xf32>
    %125 = vector.extract_strided_slice %114 {offsets = [0, 128], sizes = [8, 64], strides = [1, 1]} : vector<8x192xf32> to vector<8x64xf32>
    %126 = vector.extract_strided_slice %104 {offsets = [0, 128], sizes = [8, 64], strides = [1, 1]} : vector<8x192xf32> to vector<8x64xf32>
    %127 = arith.addf %126, %39 : vector<8x64xf32>
    %128 = arith.mulf %123, %127 : vector<8x64xf32>
    %129 = arith.addf %125, %128 : vector<8x64xf32>
    %130 = math.tanh %129 : vector<8x64xf32>
    %cst_28 = arith.constant 1.000000e+00 : f32
    %131 = vector.broadcast %cst_28 : f32 to vector<8x64xf32>
    %132 = arith.subf %131, %124 : vector<8x64xf32>
    %133 = arith.mulf %132, %130 : vector<8x64xf32>
    %134 = arith.mulf %124, %103 : vector<8x64xf32>
    %135 = arith.addf %133, %134 : vector<8x64xf32>
    %cst_29 = arith.constant dense<0.000000e+00> : vector<8x192xf32>
    %136 = tpu.matmul %135, %31, %cst_29 {dimension_numbers = #tpu.dot_dimension_numbers<[1], [0], [0], [1], [0, 0, 1, 1], [], []>} : vector<8x64xf32>, vector<64x192xf32>, vector<8x192xf32> -> vector<8x192xf32>
    %137 = vector.extract_strided_slice %0 {offsets = [0, 73], sizes = [8, 1], strides = [1, 1]} : vector<8x128xf32> to vector<8x1xf32>
    %138 = vector.extract_strided_slice %0 {offsets = [0, 74], sizes = [8, 1], strides = [1, 1]} : vector<8x128xf32> to vector<8x1xf32>
    %139 = vector.broadcast %137 : vector<8x1xf32> to vector<8x192xf32>
    %140 = vector.broadcast %32 : vector<1x192xf32> to vector<8x192xf32>
    %141 = arith.mulf %139, %140 : vector<8x192xf32>
    %142 = vector.broadcast %138 : vector<8x1xf32> to vector<8x192xf32>
    %143 = vector.broadcast %33 : vector<1x192xf32> to vector<8x192xf32>
    %144 = arith.mulf %142, %143 : vector<8x192xf32>
    %145 = arith.addf %141, %144 : vector<8x192xf32>
    %146 = arith.addf %145, %36 : vector<8x192xf32>
    %147 = vector.extract_strided_slice %146 {offsets = [0, 0], sizes = [8, 128], strides = [1, 1]} : vector<8x192xf32> to vector<8x128xf32>
    %148 = vector.extract_strided_slice %136 {offsets = [0, 0], sizes = [8, 128], strides = [1, 1]} : vector<8x192xf32> to vector<8x128xf32>
    %149 = arith.addf %147, %148 : vector<8x128xf32>
    %150 = arith.negf %149 : vector<8x128xf32>
    %151 = math.exp %150 : vector<8x128xf32>
    %cst_30 = arith.constant 1.000000e+00 : f32
    %152 = vector.broadcast %cst_30 : f32 to vector<8x128xf32>
    %153 = arith.addf %152, %151 : vector<8x128xf32>
    %154 = arith.divf %152, %153 : vector<8x128xf32>
    %155 = vector.extract_strided_slice %154 {offsets = [0, 0], sizes = [8, 64], strides = [1, 1]} : vector<8x128xf32> to vector<8x64xf32>
    %156 = vector.extract_strided_slice %154 {offsets = [0, 64], sizes = [8, 64], strides = [1, 1]} : vector<8x128xf32> to vector<8x64xf32>
    %157 = vector.extract_strided_slice %146 {offsets = [0, 128], sizes = [8, 64], strides = [1, 1]} : vector<8x192xf32> to vector<8x64xf32>
    %158 = vector.extract_strided_slice %136 {offsets = [0, 128], sizes = [8, 64], strides = [1, 1]} : vector<8x192xf32> to vector<8x64xf32>
    %159 = arith.addf %158, %39 : vector<8x64xf32>
    %160 = arith.mulf %155, %159 : vector<8x64xf32>
    %161 = arith.addf %157, %160 : vector<8x64xf32>
    %162 = math.tanh %161 : vector<8x64xf32>
    %cst_31 = arith.constant 1.000000e+00 : f32
    %163 = vector.broadcast %cst_31 : f32 to vector<8x64xf32>
    %164 = arith.subf %163, %156 : vector<8x64xf32>
    %165 = arith.mulf %164, %162 : vector<8x64xf32>
    %166 = arith.mulf %156, %135 : vector<8x64xf32>
    %167 = arith.addf %165, %166 : vector<8x64xf32>
    %cst_32 = arith.constant dense<0.000000e+00> : vector<8x192xf32>
    %168 = tpu.matmul %167, %31, %cst_32 {dimension_numbers = #tpu.dot_dimension_numbers<[1], [0], [0], [1], [0, 0, 1, 1], [], []>} : vector<8x64xf32>, vector<64x192xf32>, vector<8x192xf32> -> vector<8x192xf32>
    %169 = vector.extract_strided_slice %0 {offsets = [0, 74], sizes = [8, 1], strides = [1, 1]} : vector<8x128xf32> to vector<8x1xf32>
    %170 = vector.extract_strided_slice %0 {offsets = [0, 73], sizes = [8, 1], strides = [1, 1]} : vector<8x128xf32> to vector<8x1xf32>
    %171 = vector.broadcast %169 : vector<8x1xf32> to vector<8x192xf32>
    %172 = vector.broadcast %32 : vector<1x192xf32> to vector<8x192xf32>
    %173 = arith.mulf %171, %172 : vector<8x192xf32>
    %174 = vector.broadcast %170 : vector<8x1xf32> to vector<8x192xf32>
    %175 = vector.broadcast %33 : vector<1x192xf32> to vector<8x192xf32>
    %176 = arith.mulf %174, %175 : vector<8x192xf32>
    %177 = arith.addf %173, %176 : vector<8x192xf32>
    %178 = arith.addf %177, %36 : vector<8x192xf32>
    %179 = vector.extract_strided_slice %178 {offsets = [0, 0], sizes = [8, 128], strides = [1, 1]} : vector<8x192xf32> to vector<8x128xf32>
    %180 = vector.extract_strided_slice %168 {offsets = [0, 0], sizes = [8, 128], strides = [1, 1]} : vector<8x192xf32> to vector<8x128xf32>
    %181 = arith.addf %179, %180 : vector<8x128xf32>
    %182 = arith.negf %181 : vector<8x128xf32>
    %183 = math.exp %182 : vector<8x128xf32>
    %cst_33 = arith.constant 1.000000e+00 : f32
    %184 = vector.broadcast %cst_33 : f32 to vector<8x128xf32>
    %185 = arith.addf %184, %183 : vector<8x128xf32>
    %186 = arith.divf %184, %185 : vector<8x128xf32>
    %187 = vector.extract_strided_slice %186 {offsets = [0, 0], sizes = [8, 64], strides = [1, 1]} : vector<8x128xf32> to vector<8x64xf32>
    %188 = vector.extract_strided_slice %186 {offsets = [0, 64], sizes = [8, 64], strides = [1, 1]} : vector<8x128xf32> to vector<8x64xf32>
    %189 = vector.extract_strided_slice %178 {offsets = [0, 128], sizes = [8, 64], strides = [1, 1]} : vector<8x192xf32> to vector<8x64xf32>
    %190 = vector.extract_strided_slice %168 {offsets = [0, 128], sizes = [8, 64], strides = [1, 1]} : vector<8x192xf32> to vector<8x64xf32>
    %191 = arith.addf %190, %39 : vector<8x64xf32>
    %192 = arith.mulf %187, %191 : vector<8x64xf32>
    %193 = arith.addf %189, %192 : vector<8x64xf32>
    %194 = math.tanh %193 : vector<8x64xf32>
    %cst_34 = arith.constant 1.000000e+00 : f32
    %195 = vector.broadcast %cst_34 : f32 to vector<8x64xf32>
    %196 = arith.subf %195, %188 : vector<8x64xf32>
    %197 = arith.mulf %196, %194 : vector<8x64xf32>
    %198 = arith.mulf %188, %167 : vector<8x64xf32>
    %199 = arith.addf %197, %198 : vector<8x64xf32>
    %cst_35 = arith.constant dense<0.000000e+00> : vector<8x192xf32>
    %200 = tpu.matmul %199, %31, %cst_35 {dimension_numbers = #tpu.dot_dimension_numbers<[1], [0], [0], [1], [0, 0, 1, 1], [], []>} : vector<8x64xf32>, vector<64x192xf32>, vector<8x192xf32> -> vector<8x192xf32>
    %201 = vector.extract_strided_slice %0 {offsets = [0, 75], sizes = [8, 1], strides = [1, 1]} : vector<8x128xf32> to vector<8x1xf32>
    %202 = vector.extract_strided_slice %0 {offsets = [0, 72], sizes = [8, 1], strides = [1, 1]} : vector<8x128xf32> to vector<8x1xf32>
    %203 = vector.broadcast %201 : vector<8x1xf32> to vector<8x192xf32>
    %204 = vector.broadcast %32 : vector<1x192xf32> to vector<8x192xf32>
    %205 = arith.mulf %203, %204 : vector<8x192xf32>
    %206 = vector.broadcast %202 : vector<8x1xf32> to vector<8x192xf32>
    %207 = vector.broadcast %33 : vector<1x192xf32> to vector<8x192xf32>
    %208 = arith.mulf %206, %207 : vector<8x192xf32>
    %209 = arith.addf %205, %208 : vector<8x192xf32>
    %210 = arith.addf %209, %36 : vector<8x192xf32>
    %211 = vector.extract_strided_slice %210 {offsets = [0, 0], sizes = [8, 128], strides = [1, 1]} : vector<8x192xf32> to vector<8x128xf32>
    %212 = vector.extract_strided_slice %200 {offsets = [0, 0], sizes = [8, 128], strides = [1, 1]} : vector<8x192xf32> to vector<8x128xf32>
    %213 = arith.addf %211, %212 : vector<8x128xf32>
    %214 = arith.negf %213 : vector<8x128xf32>
    %215 = math.exp %214 : vector<8x128xf32>
    %cst_36 = arith.constant 1.000000e+00 : f32
    %216 = vector.broadcast %cst_36 : f32 to vector<8x128xf32>
    %217 = arith.addf %216, %215 : vector<8x128xf32>
    %218 = arith.divf %216, %217 : vector<8x128xf32>
    %219 = vector.extract_strided_slice %218 {offsets = [0, 0], sizes = [8, 64], strides = [1, 1]} : vector<8x128xf32> to vector<8x64xf32>
    %220 = vector.extract_strided_slice %218 {offsets = [0, 64], sizes = [8, 64], strides = [1, 1]} : vector<8x128xf32> to vector<8x64xf32>
    %221 = vector.extract_strided_slice %210 {offsets = [0, 128], sizes = [8, 64], strides = [1, 1]} : vector<8x192xf32> to vector<8x64xf32>
    %222 = vector.extract_strided_slice %200 {offsets = [0, 128], sizes = [8, 64], strides = [1, 1]} : vector<8x192xf32> to vector<8x64xf32>
    %223 = arith.addf %222, %39 : vector<8x64xf32>
    %224 = arith.mulf %219, %223 : vector<8x64xf32>
    %225 = arith.addf %221, %224 : vector<8x64xf32>
    %226 = math.tanh %225 : vector<8x64xf32>
    %cst_37 = arith.constant 1.000000e+00 : f32
    %227 = vector.broadcast %cst_37 : f32 to vector<8x64xf32>
    %228 = arith.subf %227, %220 : vector<8x64xf32>
    %229 = arith.mulf %228, %226 : vector<8x64xf32>
    %230 = arith.mulf %220, %199 : vector<8x64xf32>
    %231 = arith.addf %229, %230 : vector<8x64xf32>
    %cst_38 = arith.constant dense<0.000000e+00> : vector<8x192xf32>
    %232 = tpu.matmul %231, %31, %cst_38 {dimension_numbers = #tpu.dot_dimension_numbers<[1], [0], [0], [1], [0, 0, 1, 1], [], []>} : vector<8x64xf32>, vector<64x192xf32>, vector<8x192xf32> -> vector<8x192xf32>
    %233 = vector.extract_strided_slice %0 {offsets = [0, 76], sizes = [8, 1], strides = [1, 1]} : vector<8x128xf32> to vector<8x1xf32>
    %234 = vector.extract_strided_slice %0 {offsets = [0, 71], sizes = [8, 1], strides = [1, 1]} : vector<8x128xf32> to vector<8x1xf32>
    %235 = vector.broadcast %233 : vector<8x1xf32> to vector<8x192xf32>
    %236 = vector.broadcast %32 : vector<1x192xf32> to vector<8x192xf32>
    %237 = arith.mulf %235, %236 : vector<8x192xf32>
    %238 = vector.broadcast %234 : vector<8x1xf32> to vector<8x192xf32>
    %239 = vector.broadcast %33 : vector<1x192xf32> to vector<8x192xf32>
    %240 = arith.mulf %238, %239 : vector<8x192xf32>
    %241 = arith.addf %237, %240 : vector<8x192xf32>
    %242 = arith.addf %241, %36 : vector<8x192xf32>
    %243 = vector.extract_strided_slice %242 {offsets = [0, 0], sizes = [8, 128], strides = [1, 1]} : vector<8x192xf32> to vector<8x128xf32>
    %244 = vector.extract_strided_slice %232 {offsets = [0, 0], sizes = [8, 128], strides = [1, 1]} : vector<8x192xf32> to vector<8x128xf32>
    %245 = arith.addf %243, %244 : vector<8x128xf32>
    %246 = arith.negf %245 : vector<8x128xf32>
    %247 = math.exp %246 : vector<8x128xf32>
    %cst_39 = arith.constant 1.000000e+00 : f32
    %248 = vector.broadcast %cst_39 : f32 to vector<8x128xf32>
    %249 = arith.addf %248, %247 : vector<8x128xf32>
    %250 = arith.divf %248, %249 : vector<8x128xf32>
    %251 = vector.extract_strided_slice %250 {offsets = [0, 0], sizes = [8, 64], strides = [1, 1]} : vector<8x128xf32> to vector<8x64xf32>
    %252 = vector.extract_strided_slice %250 {offsets = [0, 64], sizes = [8, 64], strides = [1, 1]} : vector<8x128xf32> to vector<8x64xf32>
    %253 = vector.extract_strided_slice %242 {offsets = [0, 128], sizes = [8, 64], strides = [1, 1]} : vector<8x192xf32> to vector<8x64xf32>
    %254 = vector.extract_strided_slice %232 {offsets = [0, 128], sizes = [8, 64], strides = [1, 1]} : vector<8x192xf32> to vector<8x64xf32>
    %255 = arith.addf %254, %39 : vector<8x64xf32>
    %256 = arith.mulf %251, %255 : vector<8x64xf32>
    %257 = arith.addf %253, %256 : vector<8x64xf32>
    %258 = math.tanh %257 : vector<8x64xf32>
    %cst_40 = arith.constant 1.000000e+00 : f32
    %259 = vector.broadcast %cst_40 : f32 to vector<8x64xf32>
    %260 = arith.subf %259, %252 : vector<8x64xf32>
    %261 = arith.mulf %260, %258 : vector<8x64xf32>
    %262 = arith.mulf %252, %231 : vector<8x64xf32>
    %263 = arith.addf %261, %262 : vector<8x64xf32>
    %cst_41 = arith.constant dense<0.000000e+00> : vector<8x192xf32>
    %264 = tpu.matmul %263, %31, %cst_41 {dimension_numbers = #tpu.dot_dimension_numbers<[1], [0], [0], [1], [0, 0, 1, 1], [], []>} : vector<8x64xf32>, vector<64x192xf32>, vector<8x192xf32> -> vector<8x192xf32>
    %265 = vector.extract_strided_slice %0 {offsets = [0, 77], sizes = [8, 1], strides = [1, 1]} : vector<8x128xf32> to vector<8x1xf32>
    %266 = vector.extract_strided_slice %0 {offsets = [0, 70], sizes = [8, 1], strides = [1, 1]} : vector<8x128xf32> to vector<8x1xf32>
    %267 = vector.broadcast %265 : vector<8x1xf32> to vector<8x192xf32>
    %268 = vector.broadcast %32 : vector<1x192xf32> to vector<8x192xf32>
    %269 = arith.mulf %267, %268 : vector<8x192xf32>
    %270 = vector.broadcast %266 : vector<8x1xf32> to vector<8x192xf32>
    %271 = vector.broadcast %33 : vector<1x192xf32> to vector<8x192xf32>
    %272 = arith.mulf %270, %271 : vector<8x192xf32>
    %273 = arith.addf %269, %272 : vector<8x192xf32>
    %274 = arith.addf %273, %36 : vector<8x192xf32>
    %275 = vector.extract_strided_slice %274 {offsets = [0, 0], sizes = [8, 128], strides = [1, 1]} : vector<8x192xf32> to vector<8x128xf32>
    %276 = vector.extract_strided_slice %264 {offsets = [0, 0], sizes = [8, 128], strides = [1, 1]} : vector<8x192xf32> to vector<8x128xf32>
    %277 = arith.addf %275, %276 : vector<8x128xf32>
    %278 = arith.negf %277 : vector<8x128xf32>
    %279 = math.exp %278 : vector<8x128xf32>
    %cst_42 = arith.constant 1.000000e+00 : f32
    %280 = vector.broadcast %cst_42 : f32 to vector<8x128xf32>
    %281 = arith.addf %280, %279 : vector<8x128xf32>
    %282 = arith.divf %280, %281 : vector<8x128xf32>
    %283 = vector.extract_strided_slice %282 {offsets = [0, 0], sizes = [8, 64], strides = [1, 1]} : vector<8x128xf32> to vector<8x64xf32>
    %284 = vector.extract_strided_slice %282 {offsets = [0, 64], sizes = [8, 64], strides = [1, 1]} : vector<8x128xf32> to vector<8x64xf32>
    %285 = vector.extract_strided_slice %274 {offsets = [0, 128], sizes = [8, 64], strides = [1, 1]} : vector<8x192xf32> to vector<8x64xf32>
    %286 = vector.extract_strided_slice %264 {offsets = [0, 128], sizes = [8, 64], strides = [1, 1]} : vector<8x192xf32> to vector<8x64xf32>
    %287 = arith.addf %286, %39 : vector<8x64xf32>
    %288 = arith.mulf %283, %287 : vector<8x64xf32>
    %289 = arith.addf %285, %288 : vector<8x64xf32>
    %290 = math.tanh %289 : vector<8x64xf32>
    %cst_43 = arith.constant 1.000000e+00 : f32
    %291 = vector.broadcast %cst_43 : f32 to vector<8x64xf32>
    %292 = arith.subf %291, %284 : vector<8x64xf32>
    %293 = arith.mulf %292, %290 : vector<8x64xf32>
    %294 = arith.mulf %284, %263 : vector<8x64xf32>
    %295 = arith.addf %293, %294 : vector<8x64xf32>
    %c64 = arith.constant 64 : index
    %c0_44 = arith.constant 0 : index
    %296 = vector.load %arg3[%c64, %c0_44] : memref<464x256xf32, #tpu.memory_space<vmem>>, vector<64x128xf32>
    %cst_45 = arith.constant dense<0.000000e+00> : vector<8x128xf32>
    %297 = tpu.matmul %295, %296, %cst_45 {dimension_numbers = #tpu.dot_dimension_numbers<[1], [0], [0], [1], [0, 0, 1, 1], [], []>} : vector<8x64xf32>, vector<64x128xf32>, vector<8x128xf32> -> vector<8x128xf32>
    %298 = arith.addf %3, %297 : vector<8x128xf32>
    %c456 = arith.constant 456 : index
    %c0_46 = arith.constant 0 : index
    %299 = vector.load %arg3[%c456, %c0_46] : memref<464x256xf32, #tpu.memory_space<vmem>>, vector<1x128xf32>
    %300 = vector.broadcast %299 : vector<1x128xf32> to vector<8x128xf32>
    %301 = arith.addf %298, %300 : vector<8x128xf32>
    %cst_47 = arith.constant 0.000000e+00 : f32
    %302 = vector.broadcast %cst_47 : f32 to vector<8x128xf32>
    %303 = arith.maximumf %301, %302 : vector<8x128xf32>
    %c128 = arith.constant 128 : index
    %c0_48 = arith.constant 0 : index
    %304 = vector.load %arg3[%c128, %c0_48] : memref<464x256xf32, #tpu.memory_space<vmem>>, vector<128x64xf32>
    %cst_49 = arith.constant dense<0.000000e+00> : vector<8x64xf32>
    %305 = tpu.matmul %303, %304, %cst_49 {dimension_numbers = #tpu.dot_dimension_numbers<[1], [0], [0], [1], [0, 0, 1, 1], [], []>} : vector<8x128xf32>, vector<128x64xf32>, vector<8x64xf32> -> vector<8x64xf32>
    %c457 = arith.constant 457 : index
    %c0_50 = arith.constant 0 : index
    %306 = vector.load %arg3[%c457, %c0_50] : memref<464x256xf32, #tpu.memory_space<vmem>>, vector<1x64xf32>
    %307 = vector.broadcast %306 : vector<1x64xf32> to vector<8x64xf32>
    %308 = arith.addf %305, %307 : vector<8x64xf32>
    %cst_51 = arith.constant 0.000000e+00 : f32
    %309 = vector.broadcast %cst_51 : f32 to vector<8x64xf32>
    %310 = arith.maximumf %308, %309 : vector<8x64xf32>
    %c256 = arith.constant 256 : index
    %c0_52 = arith.constant 0 : index
    %311 = vector.load %arg3[%c256, %c0_52] : memref<464x256xf32, #tpu.memory_space<vmem>>, vector<64x16xf32>
    %cst_53 = arith.constant dense<0.000000e+00> : vector<8x16xf32>
    %312 = tpu.matmul %310, %311, %cst_53 {dimension_numbers = #tpu.dot_dimension_numbers<[1], [0], [0], [1], [0, 0, 1, 1], [], []>} : vector<8x64xf32>, vector<64x16xf32>, vector<8x16xf32> -> vector<8x16xf32>
    %c458 = arith.constant 458 : index
    %c0_54 = arith.constant 0 : index
    %313 = vector.load %arg3[%c458, %c0_54] : memref<464x256xf32, #tpu.memory_space<vmem>>, vector<1x16xf32>
    %314 = vector.broadcast %313 : vector<1x16xf32> to vector<8x16xf32>
    %315 = arith.addf %312, %314 : vector<8x16xf32>
    %316 = vector.extract_strided_slice %315 {offsets = [0, 0], sizes = [8, 8], strides = [1, 1]} : vector<8x16xf32> to vector<8x8xf32>
    %317 = vector.extract_strided_slice %315 {offsets = [0, 8], sizes = [8, 8], strides = [1, 1]} : vector<8x16xf32> to vector<8x8xf32>
    %cst_55 = arith.constant 0.000000e+00 : f32
    %318 = vector.broadcast %cst_55 : f32 to vector<8x8xf32>
    %319 = arith.subf %318, %25 : vector<8x8xf32>
    %320 = math.exp %319 : vector<8x8xf32>
    %321 = math.exp %317 : vector<8x8xf32>
    %322 = arith.mulf %321, %320 : vector<8x8xf32>
    %323 = arith.subf %24, %316 : vector<8x8xf32>
    %324 = arith.mulf %323, %323 : vector<8x8xf32>
    %325 = arith.mulf %324, %320 : vector<8x8xf32>
    %326 = arith.addf %322, %325 : vector<8x8xf32>
    %cst_56 = arith.constant 1.000000e+00 : f32
    %327 = vector.broadcast %cst_56 : f32 to vector<8x8xf32>
    %328 = arith.subf %326, %327 : vector<8x8xf32>
    %329 = arith.subf %25, %317 : vector<8x8xf32>
    %330 = arith.addf %328, %329 : vector<8x8xf32>
    %cst_57 = arith.constant 5.000000e-01 : f32
    %331 = vector.broadcast %cst_57 : f32 to vector<8x8xf32>
    %332 = arith.mulf %331, %330 : vector<8x8xf32>
    %cst_58 = arith.constant dense<0.000000e+00> : vector<8xf32>
    %333 = vector.multi_reduction <add>, %332, %cst_58 [1] : vector<8x8xf32> to vector<8xf32>
    %334 = vector.shape_cast %333 : vector<8xf32> to vector<8x1xf32>
    %c0_59 = arith.constant 0 : index
    %c0_60 = arith.constant 0 : index
    %335 = vector.load %arg5[%c0_59, %c0_60] : memref<8x1xf32, #tpu.memory_space<vmem>>, vector<8x1xf32>
    tpu.vector_store %arg5[%c0_59, %c0_60], %334 {strides = array<i32>} : memref<8x1xf32, #tpu.memory_space<vmem>>, vector<8x1xf32>,
    %336 = vector.extract_strided_slice %0 {offsets = [0, 32], sizes = [8, 32], strides = [1, 1]} : vector<8x128xf32> to vector<8x32xf32>
    %cst_61 = arith.constant 5.000000e-01 : f32
    %337 = vector.broadcast %cst_61 : f32 to vector<8x8xf32>
    %338 = arith.mulf %337, %317 : vector<8x8xf32>
    %339 = math.exp %338 : vector<8x8xf32>
    %340 = tpu.concatenate %316, %316, %316, %316 in 1 : vector<8x8xf32>, vector<8x8xf32>, vector<8x8xf32>, vector<8x8xf32> -> vector<8x32xf32>
    %341 = tpu.concatenate %339, %339, %339, %339 in 1 : vector<8x8xf32>, vector<8x8xf32>, vector<8x8xf32>, vector<8x8xf32> -> vector<8x32xf32>
    %342 = arith.mulf %336, %341 : vector<8x32xf32>
    %343 = arith.addf %340, %342 : vector<8x32xf32>
    %c416 = arith.constant 416 : index
    %c0_62 = arith.constant 0 : index
    %344 = vector.load %arg3[%c416, %c0_62] : memref<464x256xf32, #tpu.memory_space<vmem>>, vector<32x128xf32>
    %cst_63 = arith.constant dense<0.000000e+00> : vector<8x128xf32>
    %345 = tpu.matmul %343, %344, %cst_63 {dimension_numbers = #tpu.dot_dimension_numbers<[1], [0], [0], [1], [0, 0, 1, 1], [], []>} : vector<8x32xf32>, vector<32x128xf32>, vector<8x128xf32> -> vector<8x128xf32>
    %346 = arith.addf %4, %345 : vector<8x128xf32>
    %c459 = arith.constant 459 : index
    %c0_64 = arith.constant 0 : index
    %347 = vector.load %arg3[%c459, %c0_64] : memref<464x256xf32, #tpu.memory_space<vmem>>, vector<1x128xf32>
    %348 = vector.broadcast %347 : vector<1x128xf32> to vector<8x128xf32>
    %349 = arith.addf %346, %348 : vector<8x128xf32>
    %cst_65 = arith.constant 0.000000e+00 : f32
    %350 = vector.broadcast %cst_65 : f32 to vector<8x128xf32>
    %351 = arith.maximumf %349, %350 : vector<8x128xf32>
    %c0_66 = arith.constant 0 : index
    %c0_67 = arith.constant 0 : index
    %352 = vector.load %arg4[%c0_66, %c0_67] : memref<8x128xf32, #tpu.memory_space<vmem>>, vector<8x128xf32>
    tpu.vector_store %arg4[%c0_66, %c0_67], %351 {strides = array<i32>} : memref<8x128xf32, #tpu.memory_space<vmem>>, vector<8x128xf32>,
    return
  }
  func.func @transform_0(%arg0: i32) -> (i32, i32) {
    %c0_i32 = arith.constant 0 : i32
    %c0_i32_0 = arith.constant 0 : i32
    return %arg0, %c0_i32 : i32, i32
  }
  func.func @transform_1(%arg0: i32) -> (i32, i32) {
    %c0_i32 = arith.constant 0 : i32
    %c0_i32_0 = arith.constant 0 : i32
    %c0_i32_1 = arith.constant 0 : i32
    return %c0_i32, %c0_i32_0 : i32, i32
  }
  func.func @transform_2(%arg0: i32) -> (i32, i32) {
    %c0_i32 = arith.constant 0 : i32
    %c0_i32_0 = arith.constant 0 : i32
    %c0_i32_1 = arith.constant 0 : i32
    return %c0_i32, %c0_i32_0 : i32, i32
  }
  func.func @transform_3(%arg0: i32) -> (i32, i32) {
    %c0_i32 = arith.constant 0 : i32
    %c0_i32_0 = arith.constant 0 : i32
    return %arg0, %c0_i32 : i32, i32
  }
  func.func @transform_4(%arg0: i32) -> (i32, i32) {
    %c0_i32 = arith.constant 0 : i32
    %c0_i32_0 = arith.constant 0 : i32
    return %arg0, %c0_i32 : i32, i32
  }
}

</mosaic_0001>

<bundles_post_ra>
// kernel: tpu_custom_call.1
= control target key start
LH: loop header
LB: loop body
LE: loop exit
PB: predicated region body
PF: predicated region fallthrough
CT: control target
= control target key end

     0   :  { %10 = vsyncpa [#allocation3], 0  ;;  %s2865_s0 = inlined_call_operand.hbm [shape: f32[8,128], index: 0, kind: input, shape index: {}]   ;;  %s2866_s1 = inlined_call_operand.hbm [shape: f32[128,384], index: 1, kind: input, shape index: {}]   ;;  %s2867_s2 = inlined_call_operand.hbm [shape: f32[464,256], index: 2, kind: input, shape index: {}]   ;;  %s2868_s3 = inlined_call_operand.hbm [shape: f32[8,128], index: 3, kind: output, shape index: {0}]   ;;  %s2869_s4 = inlined_call_operand.vmem [shape: f32[8,1], index: 4, kind: output, shape index: {1}]  }
   0x1   :  { %11 = vsyncpa [#allocation6], 0 }
   0x2   :  { %12 = vsyncpa [#allocation4], 0  ;;  %s2443_s15 = smov [#allocation5]   ;;  %s2349_s19 = scalar_lea.hbm %s2866_s1, 6144 }
   0x3   :  { %s28_s16 = sshll.u32 %s2443_s15, 4  ;;  %p2350_p0 = scmp.ne.s32.totalorder %s2866_s1, %s2349_s19  ;;  %s29_s16 = int_to_ptr.vmem [resolvable:$true] %s28_s16 }
   0x4   :  { %p2353_p1 = scmp.lt.u32.totalorder %s2349_s19, %s2866_s1 }
   0x6   :  { %p2355_p2 = pnand %p2353_p1, %p2350_p0 }
   0x8   :  { %2358 = shalt.err (!%p2355_p2)
}
   0x9   :  { %s2359_s24 = scalar_lea.vmem %s29_s16, 6144  ;;  %p2364_p4 = scmp.lt.s32.totalorder %s29_s16, %s29_s16 }
   0xa   :  { %p2360_p3 = scmp.ne.s32.totalorder %s29_s16, %s2359_s24  ;;  %p2365_p5 = scmp.lt.s32.totalorder %s2359_s24, %s2359_s24 }
   0xc   :  { %p2366_p6 = por %p2365_p5, %p2364_p4 }
   0xe   :  { %p2367_p7 = pnand %p2366_p6, %p2360_p3 }
  0x10   :  { %2370 = shalt.err (!%p2367_p7)
}
  0x11   :  { %s2444_s25 = smov 384   ;;  %s2445_s26 = smov 24  }
  0x12   :  { %34 = dma.hbm_to_vmem [thread:$0]  %s2866_s1, 6144, %s29_s16, [#allocation6], %s2444_s25, %s2444_s25, %s2445_s26  }
  0x13   :  { %s2446_s29 = smov [#allocation2]   ;;  %s2447_s5 = smov [#allocation7]  }
  0x14   :  { %s19_s30 = sshll.u32 %s2446_s29, 4  ;;  %s40_s6 = sshll.u32 %s2447_s5, 4  ;;  %s20_s30 = int_to_ptr.vmem [resolvable:$true] %s19_s30  ;;  %s41_s6 = int_to_ptr.vmem [resolvable:$true] %s40_s6 }
  0x15   :  { %s2371_s9 = scalar_lea.hbm %s2865_s0, 128 }
  0x16   :  { %p2372_p8 = scmp.ne.s32.totalorder %s2865_s0, %s2371_s9  ;;  %p2375_p9 = scmp.lt.u32.totalorder %s2371_s9, %s2865_s0 }
  0x18   :  { %p2377_p10 = pnand %p2375_p9, %p2372_p8 }
  0x1a   :  { %2380 = shalt.err (!%p2377_p10)
}
  0x1b   :  { %s2381_s1 = scalar_lea.vmem %s20_s30, 128  ;;  %p2386_p12 = scmp.lt.s32.totalorder %s20_s30, %s20_s30 }
  0x1c   :  { %p2382_p11 = scmp.ne.s32.totalorder %s20_s30, %s2381_s1  ;;  %p2387_p13 = scmp.lt.s32.totalorder %s2381_s1, %s2381_s1 }
  0x1e   :  { %p2388_p0 = por %p2387_p13, %p2386_p12 }
  0x20   :  { %p2389_p1 = pnand %p2388_p0, %p2382_p11 }
  0x22   :  { %2392 = shalt.err (!%p2389_p1)
}
  0x23   :  { %22 = dma.hbm_to_vmem [thread:$0]  %s2865_s0, 128, %s20_s30, [#allocation3]  }
  0x24   :  { %s2393_s18 = scalar_lea.hbm %s2867_s2, 14848 }
  0x25   :  { %p2394_p2 = scmp.ne.s32.totalorder %s2867_s2, %s2393_s18  ;;  %p2397_p3 = scmp.lt.u32.totalorder %s2393_s18, %s2867_s2 }
  0x27   :  { %p2399_p4 = pnand %p2397_p3, %p2394_p2 }
  0x29   :  { %2402 = shalt.err (!%p2399_p4)
}
  0x2a   :  { %s2403_s23 = scalar_lea.vmem %s41_s6, 14848  ;;  %p2408_p6 = scmp.lt.s32.totalorder %s41_s6, %s41_s6 }
  0x2b   :  { %p2404_p5 = scmp.ne.s32.totalorder %s41_s6, %s2403_s23  ;;  %p2409_p7 = scmp.lt.s32.totalorder %s2403_s23, %s2403_s23 }
  0x2d   :  { %p2410_p8 = por %p2409_p7, %p2408_p6 }
  0x2f   :  { %p2411_p9 = pnand %p2410_p8, %p2404_p5 }
  0x31   :  { %2414 = shalt.err (!%p2411_p9)
}
  0x32   :  { %s2448_s0 = smov 256   ;;  %s2449_s24 = smov 16  }
  0x33   :  { %46 = dma.hbm_to_vmem [thread:$0]  %s2867_s2, 14848, %s41_s6, [#allocation6], %s2448_s0, %s2448_s0, %s2449_s24  }
  0x34   :  { %2437 = dma.done.wait [#allocation3], 128  }
  0x35   :  { %2438 = vsyncadd [#allocation3], 4294967168 }
  0x36   :  { %2439 = dma.done.wait [#allocation6], 20992  }
  0x37   :  { %2440 = vsyncadd [#allocation6], 4294946304  ;;  %v2450_v0 = vmov 0.0|0.0   ;;  %vm2451_vm0 = vmmov 0   ;;  %v2452_v1 = vmov 0.0   ;;  %v59_v2 = vld [vmem:[#allocation5 + $0x10] sm:$0xff] }
  0x38   :  { %2037 = vmatprep.subr.bf16.mxu1 %v2450_v0  ;;  %1888 = vmatprep.mubr.msk.f32.mxu1 %vm2451_vm0, %v2452_v1  ;;  %v62_v3 = vld [vmem:[#allocation5 + $0x28] sm:$0xff]  ;;  %v65_v4 = vld [vmem:[#allocation5 + $0x40] sm:$0xff]  ;;  %v68_v6 = vld [vmem:[#allocation5 + $0x58] sm:$0xff]  ;;  %s2453_s2 = smov 64   ;;  %vm258_vm1 = vcmask 523264   ;;  %vm338_vm2 = vcmask 261120  }
  0x39   :  { %169 = vmatprep.mubr.f32.mxu0 %v2452_v1  ;;  %v2038_v5 = vpack.c.bf16 %v62_v3, %v59_v2  ;;  %v2041_v7 = vpack.c.bf16 %v68_v6, %v65_v4  ;;  %v71_v8 = vld [vmem:[#allocation5 + $0x70] sm:$0xff]  ;;  %v74_v9 = vld [vmem:[#allocation5 + $0x88] sm:$0xff]  ;;  %v412_v10 = vld [vmem:[#allocation7 + $0x384] ss:$0 sm:$0xff]  ;;  %s2462_s28 = smov 8   ;;  %s2463_s29 = smov 120  }
  0x3a   :  { %v77_v11 = vld [vmem:[#allocation5 + $0xa0] sm:$0xff]  ;;  %v80_v12 = vld [vmem:[#allocation5 + $0xb8] sm:$0xff]  ;;  %414 = vrot.lane.b32.xlu0 %v412_v10, %s2453_s2  ;;  %v58_v13 = vld [vmem:[#allocation5 + $0x8] sm:$0xff]  ;;  %v2044_v16 = vpack.c.bf16 %v74_v9, %v71_v8  ;;  %vm1614_vm3 = vcmask 64512   ;;  %vm1634_vm4 = vcmask 130048   ;;  %vm1636_vm5 = vcmask 195584  }
  0x3b   :  { %2039 = vmatpush3.bf16.msra.mxu1 %v2038_v5  ;;  %v61_v14 = vld [vmem:[#allocation5 + $0x20] sm:$0xff]  ;;  %v60_v18 = vld [vmem:[#allocation5 + $0x18] sm:$0xff]  ;;  %v67_v20 = vld [vmem:[#allocation5 + $0x50] sm:$0xff]  ;;  %v2047_v28 = vpack.c.bf16 %v80_v12, %v77_v11  ;;  %s2465_s30 = smov 96   ;;  %s2466_s5 = smov [#allocation8]  }
  0x3c   :  { %2040 = vmatprep.subr.bf16.mxu1 %v2450_v0  ;;  %v57_v15 = vld [vmem:[#allocation5] sm:$0xff]  ;;  %v2005_v17 = vpack.c.bf16 %v61_v14, %v58_v13  ;;  %v64_v19 = vld [vmem:[#allocation5 + $0x38] sm:$0xff]  ;;  %v63_v23 = vld [vmem:[#allocation5 + $0x30] sm:$0xff]  ;;  %s1749_s6 = sshll.u32 %s2466_s5, 4  ;;  %s1750_s6 = int_to_ptr.vmem [resolvable:$true] %s1749_s6 }
  0x3d   :  { %v2007_v21 = vpack.c.bf16 %v60_v18, %v57_v15  ;;  %v2009_v22 = vpack.c.bf16 %v67_v20, %v64_v19  ;;  %v66_v24 = vld [vmem:[#allocation5 + $0x48] sm:$0xff]  ;;  %v73_v26 = vld [vmem:[#allocation5 + $0x80] sm:$0xff]  ;;  %v83_v29 = vld [vmem:[#allocation5 + $0xd0] sm:$0xff]  ;;  %s2415_s7 = scalar_lea.vmem %s1750_s6, 128  ;;  %p2420_p11 = scmp.lt.s32.totalorder %s1750_s6, %s1750_s6 }
  0x3e   :  { %v70_v25 = vld [vmem:[#allocation5 + $0x68] sm:$0xff]  ;;  %2006 = vmatprep.subr.bf16.mxu0 %v2005_v17  ;;  %v2011_v27 = vpack.c.bf16 %v66_v24, %v63_v23  ;;  %v69_v31 = vld [vmem:[#allocation5 + $0x60] sm:$0xff]  ;;  %v72_v32 = vld [vmem:[#allocation5 + $0x78] sm:$0xff]  ;;  %p2416_p10 = scmp.ne.s32.totalorder %s1750_s6, %s2415_s7  ;;  %p2421_p12 = scmp.lt.s32.totalorder %s2415_s7, %s2415_s7 }
  0x3f   :  { %2042 = vmatpush3.bf16.msra.mxu1 %v2041_v7  ;;  %2008 = vmatpush1.bf16.msra.mxu0 %v2007_v21  ;;  %v2013_v30 = vpack.c.bf16 %v73_v26, %v70_v25  ;;  %v86_v33 = vld [vmem:[#allocation5 + $0xe8] sm:$0xff]  ;;  %v76_v34 = vld [vmem:[#allocation5 + $0x98] sm:$0xff]  ;;  %v79_v35 = vld [vmem:[#allocation5 + $0xb0] sm:$0xff]  ;;  %v2015_v36 = vpack.c.bf16 %v72_v32, %v69_v31 }
  0x40   :  { %2043 = vmatprep.subr.bf16.mxu1 %v2450_v0  ;;  %2010 = vmatprep.subr.bf16.mxu0 %v2009_v22  ;;  %v2050_v37 = vpack.c.bf16 %v86_v33, %v83_v29  ;;  %v89_v38 = vld [vmem:[#allocation5 + $0x100] sm:$0xff]  ;;  %v2017_v39 = vpack.c.bf16 %v79_v35, %v76_v34  ;;  %v75_v40 = vld [vmem:[#allocation5 + $0x90] sm:$0xff]  ;;  %v78_v41 = vld [vmem:[#allocation5 + $0xa8] sm:$0xff]  ;;  %p2422_p13 = por %p2421_p12, %p2420_p11 }
  0x41   :  { %v92_v42 = vld [vmem:[#allocation5 + $0x118] sm:$0xff]  ;;  %v82_v43 = vld [vmem:[#allocation5 + $0xc8] sm:$0xff]  ;;  %v85_v44 = vld [vmem:[#allocation5 + $0xe0] sm:$0xff]  ;;  %v2019_v45 = vpack.c.bf16 %v78_v41, %v75_v40 }
  0x42   :  { %v2053_v46 = vpack.c.bf16 %v92_v42, %v89_v38  ;;  %v95_v47 = vld [vmem:[#allocation5 + $0x130] sm:$0xff]  ;;  %v2021_v48 = vpack.c.bf16 %v85_v44, %v82_v43  ;;  %v81_v49 = vld [vmem:[#allocation5 + $0xc0] sm:$0xff]  ;;  %v84_v50 = vld [vmem:[#allocation5 + $0xd8] sm:$0xff]  ;;  %p2423_p0 = pnand %p2422_p13, %p2416_p10 }
  0x43   :  { %2045 = vmatpush3.bf16.msra.mxu1 %v2044_v16  ;;  %2012 = vmatpush1.bf16.msra.mxu0 %v2011_v27  ;;  %v98_v51 = vld [vmem:[#allocation5 + $0x148] sm:$0xff]  ;;  %v88_v52 = vld [vmem:[#allocation5 + $0xf8] sm:$0xff]  ;;  %v91_v53 = vld [vmem:[#allocation5 + $0x110] sm:$0xff]  ;;  %v2023_v54 = vpack.c.bf16 %v84_v50, %v81_v49 }
  0x44   :  { %2046 = vmatprep.subr.bf16.mxu1 %v2450_v0  ;;  %2014 = vmatprep.subr.bf16.mxu0 %v2013_v30  ;;  %v2056_v55 = vpack.c.bf16 %v98_v51, %v95_v47  ;;  %v101_v56 = vld [vmem:[#allocation5 + $0x160] sm:$0xff]  ;;  %v2025_v57 = vpack.c.bf16 %v91_v53, %v88_v52  ;;  %v87_v58 = vld [vmem:[#allocation5 + $0xf0] sm:$0xff]  ;;  %v90_v59 = vld [vmem:[#allocation5 + $0x108] sm:$0xff] }
  0x45   :  { %v104_v60 = vld [vmem:[#allocation5 + $0x178] sm:$0xff]  ;;  %v94_v61 = vld [vmem:[#allocation5 + $0x128] sm:$0xff]  ;;  %v97_v62 = vld [vmem:[#allocation5 + $0x140] sm:$0xff]  ;;  %v2027_v63 = vpack.c.bf16 %v90_v59, %v87_v58 }
  0x46   :  { %v2059_v2 = vpack.c.bf16 %v104_v60, %v101_v56  ;;  %v2029_v3 = vpack.c.bf16 %v97_v62, %v94_v61  ;;  %v93_v4 = vld [vmem:[#allocation5 + $0x120] sm:$0xff]  ;;  %v96_v5 = vld [vmem:[#allocation5 + $0x138] sm:$0xff]  ;;  %v103_v7 = vld [vmem:[#allocation5 + $0x170] sm:$0xff] }
  0x47   :  { %2048 = vmatpush3.bf16.msra.mxu1 %v2047_v28  ;;  %2016 = vmatpush1.bf16.msra.mxu0 %v2015_v36  ;;  %v100_v6 = vld [vmem:[#allocation5 + $0x158] sm:$0xff]  ;;  %v2031_v8 = vpack.c.bf16 %v96_v5, %v93_v4  ;;  %v99_v11 = vld [vmem:[#allocation5 + $0x150] sm:$0xff]  ;;  %v102_v12 = vld [vmem:[#allocation5 + $0x168] sm:$0xff]  ;;  %v2454_v4 = vmov 70   ;;  %v2455_v5 = vmov 77  }
  0x48   :  { %2049 = vmatprep.subr.bf16.mxu1 %v2450_v0  ;;  %2018 = vmatprep.subr.bf16.mxu0 %v2017_v39  ;;  %v2542_v9 = vld [vmem:[#allocation2] sm:$0xff]  ;;  %v2033_v10 = vpack.c.bf16 %v103_v7, %v100_v6  ;;  %v2035_v13 = vpack.c.bf16 %v102_v12, %v99_v11  ;;  %v249_v14 = vld [vmem:[#allocation7 + $0x280] sm:$0xff]  ;;  %v250_v15 = vld [vmem:[#allocation7 + $0x290] sm:$0xff] }
  0x49   :  { %v2062_v16 = vpack.c.bf16 %v250_v15, %v249_v14  ;;  %v251_v17 = vld [vmem:[#allocation7 + $0x2a0] sm:$0xff]  ;;  %v252_v18 = vld [vmem:[#allocation7 + $0x2b0] sm:$0xff]  ;;  %v420_v42 = vld [vmem:[#allocation7 + $0x8] sm:$0xff]  ;;  %2285 = vset.pattern.permute.xlu1 %v2454_v4 }
  0x4a   :  { %v2065_v19 = vpack.c.bf16 %v252_v18, %v251_v17  ;;  %v253_v20 = vld [vmem:[#allocation7 + $0x2c0] sm:$0xff]  ;;  %v254_v21 = vld [vmem:[#allocation7 + $0x2d0] sm:$0xff]  ;;  %v422_v43 = vld [vmem:[#allocation7 + $0x18] sm:$0xff]  ;;  %531 = vperm.xlu1 %2285, %v2542_v9  }
  0x4b   :  { %2051 = vmatpush3.bf16.msra.mxu1 %v2050_v37  ;;  %2020 = vmatpush1.bf16.msra.mxu0 %v2019_v45  ;;  %v2068_v22 = vpack.c.bf16 %v254_v21, %v253_v20  ;;  %v255_v23 = vld [vmem:[#allocation7 + $0x2e0] sm:$0xff]  ;;  %v256_v24 = vld [vmem:[#allocation7 + $0x2f0] sm:$0xff]  ;;  %v2568_v44 = vpack.c.bf16 %v422_v43, %v420_v42  ;;  %v426_v49 = vld [vmem:[#allocation7 + $0x38] sm:$0xff] }
  0x4c   :  { %2052 = vmatprep.subr.bf16.mxu1 %v2450_v0  ;;  %2022 = vmatprep.subr.bf16.mxu0 %v2021_v48  ;;  %v2071_v25 = vpack.c.bf16 %v256_v24, %v255_v23  ;;  %v333_v26 = vld [vmem:[#allocation7 + $0x300] sm:$0xff]  ;;  %v334_v27 = vld [vmem:[#allocation7 + $0x310] sm:$0xff]  ;;  %v424_v48 = vld [vmem:[#allocation7 + $0x28] sm:$0xff] }
  0x4d   :  { %v2074_v28 = vpack.c.bf16 %v334_v27, %v333_v26  ;;  %v246_v30 = vld [vmem:[#allocation7 + $0x385] ss:$0 sm:$0xff]  ;;  %v336_v40 = vld [vmem:[#allocation7 + $0x330] sm:$0xff]  ;;  %v2575_v50 = vpack.c.bf16 %v426_v49, %v424_v48  ;;  %v432_v60 = vld [vmem:[#allocation7 + $0x68] sm:$0xff] }
  0x4e   :  { %v335_v39 = vld [vmem:[#allocation7 + $0x320] sm:$0xff]  ;;  %v425_v52 = vld [vmem:[#allocation7 + $0x30] sm:$0xff]  ;;  %v434_v61 = vld [vmem:[#allocation7 + $0x78] sm:$0xff]  ;;  %2286 = vset.pattern.permute.xlu1 %v2455_v5 }
  0x4f   :  { %2054 = vmatpush3.bf16.msra.mxu1 %v2053_v46  ;;  %2024 = vmatpush1.bf16.msra.mxu0 %v2023_v54  ;;  %v2077_v41 = vpack.c.bf16 %v336_v40, %v335_v39  ;;  %v419_v45 = vld [vmem:[#allocation7] sm:$0xff]  ;;  %v421_v46 = vld [vmem:[#allocation7 + $0x10] sm:$0xff]  ;;  %v428_v54 = vld [vmem:[#allocation7 + $0x48] sm:$0xff]  ;;  %v2587_v62 = vpack.c.bf16 %v434_v61, %v432_v60  ;;  %v2456_v60 = vmov 71   ;;  %v2457_v61 = vmov 76  }
  0x50   :  { %2055 = vmatprep.subr.bf16.mxu1 %v2450_v0  ;;  %2026 = vmatprep.subr.bf16.mxu0 %v2025_v57  ;;  %v2570_v47 = vpack.c.bf16 %v421_v46, %v419_v45  ;;  %v423_v51 = vld [vmem:[#allocation7 + $0x20] sm:$0xff]  ;;  %v429_v58 = vld [vmem:[#allocation7 + $0x50] sm:$0xff] }
  0x51   :  { %v2577_v53 = vpack.c.bf16 %v425_v52, %v423_v51  ;;  %v427_v57 = vld [vmem:[#allocation7 + $0x40] sm:$0xff]  ;;  %548 = vperm.xlu1 %2286, %v2542_v9   ;;  %2287 = vset.pattern.permute.xlu0 %v2456_v60 }
  0x52   :  { %v2583_v59 = vpack.c.bf16 %v429_v58, %v427_v57  ;;  %v257_v6 = vld [vmem:[#allocation7 + $0x386] ss:$0 sm:$0xff]  ;;  %v438_v18 = vld [vmem:[#allocation7 + $0x381] ss:$8 sm:$0x3] }
  0x53   :  { %2057 = vmatpush3.bf16.msra.mxu1 %v2056_v55  ;;  %2028 = vmatpush1.bf16.msra.mxu0 %v2027_v63  ;;  %v430_v55 = vld [vmem:[#allocation7 + $0x58] sm:$0xff]  ;;  %v431_v63 = vld [vmem:[#allocation7 + $0x60] sm:$0xff] }
  0x54   :  { %2058 = vmatprep.subr.bf16.mxu1 %v2450_v0  ;;  %2030 = vmatprep.subr.bf16.mxu0 %v2029_v3  ;;  %v2581_v56 = vpack.c.bf16 %v430_v55, %v428_v54  ;;  %v440_v26 = vld [vmem:[#allocation7 + $0x382] ss:$8 sm:$0x3]  ;;  %v2641_v46 = vld [vmem:[#allocation7 + $0x383] ss:$0 sm:$0xff] }
  0x55   :  { %2288 = vset.pattern.permute.xlu1 %v2457_v61 }
  0x57   :  { %2060 = vmatpush3.bf16.msra.mxu1 %v2059_v2  ;;  %2032 = vmatpush1.bf16.msra.mxu0 %v2031_v8  ;;  %v433_v2 = vld [vmem:[#allocation7 + $0x70] sm:$0xff] }
  0x58   :  { %2073 = vmatprep.subr.bf16.mxu1 %v2450_v0  ;;  %2034 = vmatprep.subr.bf16.mxu0 %v2033_v10  ;;  %v2589_v3 = vpack.c.bf16 %v433_v2, %v431_v63 }
  0x5a   :  { %1889 = vmatmul.mubr.f32.vlgmr.msra.gmra.mrb[0].mxu1 %v2542_v9 }
  0x5b   :  { %1918 = vmatprep.mubr.msk.f32.mxu1 %vm2451_vm0, %v2452_v1  ;;  %2036 = vmatpush1.bf16.msra.mxu0 %v2035_v13  ;;  %v442_v13 = vlaneseq }
  0x5c   :  { %2061 = vmatprep.subr.bf16.mxu0 %v2450_v0  ;;  %2075 = vmatpush3.bf16.msra.mxu1 %v2074_v28 }
  0x5d   :  { %2076 = vmatprep.subr.bf16.mxu1 %v2450_v0  ;;  %v443_v14 = vshrl.u32 %v442_v13, 7 }
  0x5e   :  { %170 = vmatmul.mubr.f32.vlgmr.msra.gmra.mrb[0].mxu0 %v2542_v9 }
  0x5f   :  { %2063 = vmatpush3.bf16.msra.mxu0 %v2062_v16  ;;  %1907 = vmatprep.mubr.msk.f32.mxu0 %vm2451_vm0, %v2452_v1  ;;  %v436_v16 = vld [vmem:[#allocation7 + $0x380] ss:$8 sm:$0x3]  ;;  %v444_v17 = vsub.s32 0, %v443_v14 }
  0x60   :  { %2064 = vmatprep.subr.bf16.mxu0 %v2450_v0  ;;  %2078 = vmatpush3.bf16.msra.mxu1 %v2077_v41 }
  0x61   :  { %2080 = vmatprep.subr.bf16.mxu1 %v2568_v44  ;;  %v2620_v21 = vrot.slane %v436_v16, %v444_v17  ;;  %v2630_v27 = vrot.slane %v440_v26, %v444_v17 }
  0x63   :  { %2066 = vmatpush3.bf16.msra.mxu0 %v2065_v19 }
  0x64   :  { %2067 = vmatprep.subr.bf16.mxu0 %v2450_v0 }
  0x67   :  { %2069 = vmatpush3.bf16.msra.mxu0 %v2068_v22  ;;  %v2622_v22 = vrot.slane %v438_v18, %v444_v17 }
  0x68   :  { %2070 = vmatprep.subr.bf16.mxu0 %v2450_v0 }
  0x6b   :  { %2072 = vmatpush3.bf16.msra.mxu0 %v2071_v25 }
  0x6c   :  { %2096 = vmatprep.subr.bf16.mxu0 %v2568_v44 }
  0xac   :  { %v415_v29 = vpop.permute.xlu0 %414 }
  0xc9   :  { %v2616_v15 = vpop.permute.xlu1 %531 }
  0xca   :  { %v545_v24 = vmul.f32 %v2620_v21, %v2616_v15 }
  0xd0   :  { %v2624_v23 = vpop.permute.xlu1 %548 }
  0xd1   :  { %v562_v25 = vmul.f32 %v2622_v22, %v2624_v23 }
  0xd3   :  { %v564_v28 = vadd.f32 %v562_v25, %v545_v24 }
 0x12d   :  { %v242_v31 = vpop.f32.mrb[0].mxu1 }
 0x12e   :  { %v247_v32 = vadd.f32 %v246_v30, %v242_v31  ;;  %v2556_v33 = vadd.f32 %v415_v29, %v242_v31  ;;  %v1890_v34 = vpop.f32.mrb[1].mxu1  ;;  %v566_v29 = vadd.f32 %v564_v28, %v2630_v27 }
 0x130   :  { %v248_v35 = vmax.f32 %v247_v32, 0.0  ;;  %v418_v36 = vmax.f32 %v2556_v33, 0.0 }
 0x131   :  { %v2564_v37 = vpop.f32.mrb[0].mxu0 }
 0x132   :  { %454 = vrot.lane.b32.xlu0 %v418_v36, %s2453_s2  ;;  %1908 = vmatmul.mubr.msk.f32.vlgmr.msra.gmra.mrb[2].mxu0 %vm258_vm1, %v248_v35  ;;  %v2566_v38 = vpop.f32.mrb[1].mxu0  ;;  %v448_v35 = vsub.s32 1, %v443_v14 }
 0x133   :  { %656 = vmatprep.mubr.f32.mxu0 %v2452_v1  ;;  %2098 = vmatpush1.bf16.msra.mxu0 %v2570_v47 }
 0x134   :  { %2100 = vmatprep.subr.bf16.mxu0 %v2575_v50  ;;  %v2633_v41 = vrot.slane %v436_v16, %v448_v35  ;;  %v2635_v42 = vrot.slane %v438_v18, %v448_v35  ;;  %v2643_v49 = vrot.slane %v440_v26, %v448_v35  ;;  %v2458_v35 = vmov 75  }
 0x136   :  { %v546_v43 = vmul.f32 %v2633_v41, %v2616_v15  ;;  %v563_v45 = vmul.f32 %v2635_v42, %v2624_v23 }
 0x137   :  { %2102 = vmatpush1.bf16.msra.mxu0 %v2577_v53 }
 0x138   :  { %2104 = vmatprep.subr.bf16.mxu0 %v2581_v56  ;;  %v565_v48 = vadd.f32 %v563_v45, %v546_v43 }
 0x13a   :  { %v567_v54 = vadd.f32 %v565_v48, %v2643_v49 }
 0x13b   :  { %2106 = vmatpush1.bf16.msra.mxu0 %v2583_v59 }
 0x13c   :  { %2108 = vmatprep.subr.bf16.mxu0 %v2587_v62 }
 0x13f   :  { %2110 = vmatpush1.bf16.msra.mxu0 %v2589_v3 }
 0x140   :  { %2128 = vmatprep.subr.bf16.mxu0 %v2568_v44 }
 0x1a4   :  { %v455_v12 = vpop.permute.xlu0 %454 }
 0x205   :  { %v328_v7 = vpop.f32.mrb[2].mxu0 }
 0x206   :  { %v329_v8 = vadd.f32 %v328_v7, %v257_v6  ;;  %v1909_v10 = vpop.f32.mrb[3].mxu0 }
 0x208   :  { %v332_v11 = vmax.f32 %v329_v8, 0.0 }
 0x20a   :  { %1919 = vmatmul.mubr.msk.f32.vlgmr.msra.gmra.mrb[2].mxu1 %vm338_vm2, %v332_v11 }
 0x20b   :  { %2082 = vmatpush1.bf16.msra.mxu1 %v2570_v47  ;;  %522 = vmatprep.mubr.f32.mxu1 %v2452_v1 }
 0x20c   :  { %2084 = vmatprep.subr.bf16.mxu1 %v2575_v50 }
 0x20f   :  { %2086 = vmatpush1.bf16.msra.mxu1 %v2577_v53 }
 0x210   :  { %2088 = vmatprep.subr.bf16.mxu1 %v2581_v56 }
 0x213   :  { %2090 = vmatpush1.bf16.msra.mxu1 %v2583_v59 }
 0x214   :  { %2092 = vmatprep.subr.bf16.mxu1 %v2587_v62 }
 0x217   :  { %2094 = vmatpush1.bf16.msra.mxu1 %v2589_v3 }
 0x218   :  { %2112 = vmatprep.subr.bf16.mxu1 %v2568_v44 }
 0x21a   :  { %1765 = vmatmul.mubr.msk.f32.vlgmr.msra.gmra.mrb[4].mxu1 %vm258_vm1, %v455_v12 }
 0x21b   :  { %2114 = vmatpush1.bf16.msra.mxu1 %v2570_v47  ;;  %767 = vmatprep.mubr.f32.mxu1 %v2452_v1 }
 0x21c   :  { %2116 = vmatprep.subr.bf16.mxu1 %v2575_v50 }
 0x21f   :  { %2118 = vmatpush1.bf16.msra.mxu1 %v2577_v53 }
 0x220   :  { %2120 = vmatprep.subr.bf16.mxu1 %v2581_v56 }
 0x223   :  { %2122 = vmatpush1.bf16.msra.mxu1 %v2583_v59 }
 0x224   :  { %2124 = vmatprep.subr.bf16.mxu1 %v2587_v62 }
 0x227   :  { %2126 = vmatpush1.bf16.msra.mxu1 %v2589_v3 }
 0x228   :  { %2144 = vmatprep.subr.bf16.mxu1 %v2568_v44 }
 0x2dd   :  { %v2618_v19 = vpop.f32.mrb[2].mxu1 }
 0x2de   :  { %v1920_v20 = vpop.f32.mrb[3].mxu1 }
 0x2ed   :  { %v524_v30 = vpop.f32.mrb[4].mxu1 }
 0x2ee   :  { %v568_v31 = vadd.f32 %v566_v29, %v524_v30  ;;  %v526_v32 = vpop.f32.mrb[5].mxu1 }
 0x2ef   :  { %v575_v51 = vadd.f32 %v526_v32, %v2641_v46 }
 0x2f0   :  { %v1766_v34 = vmul.f32 -1.442695, %v568_v31 }
 0x2f2   :  { %2294 = vpow2.f32 %v1766_v34 }
 0x2fc   :  { %v2295_v39 = vpop.eup %2294 }
 0x2fd   :  { %v572_v40 = vadd.f32 1.0, %v2295_v39  ;;  %v2459_v39 = vmov 72  }
 0x2ff   :  { %2296 = vrcp.f32 %v572_v40 }
 0x309   :  { %v2297_v52 = vpop.eup %2296 }
 0x30a   :  { %v576_v55 = vmul.f32 %v2297_v52, %v575_v51  ;;  %v579_v63 = vsub.f32 1.0, %v2297_v52  ;;  %v585_v4 = vmul.f32 %v2297_v52, %v418_v36 }
 0x30c   :  { %v577_v57 = vadd.f32 %v576_v55, %v567_v54 }
 0x30e   :  { %2298 = vtanh.f32 %v577_v57 }
 0x318   :  { %v2299_v58 = vpop.eup %2298 }
 0x319   :  { %581 = vrot.lane.b32.xlu0 %v2299_v58, %s2453_s2 }
 0x31d   :  { %664 = vperm.xlu0 %2287, %v2542_v9  }
 0x321   :  { %2290 = vset.pattern.permute.xlu0 %v2458_v35 }
 0x38b   :  { %v582_v2 = vpop.permute.xlu0 %581 }
 0x38c   :  { %v584_v5 = vmul.f32 %v582_v2, %v579_v63 }
 0x38e   :  { %v586_v6 = vadd.f32 %v585_v4, %v584_v5 }
 0x390   :  { %588 = vrot.lane.b32.xlu1 %v586_v6, %s2453_s2 }
 0x394   :  { %670 = vperm.xlu1 %2288, %v2542_v9  }
 0x398   :  { %2289 = vset.pattern.permute.xlu1 %v2459_v39 }
 0x39c   :  { %v2665_v36 = vpop.permute.xlu0 %664 }
 0x39d   :  { %v667_v10 = vmul.f32 %v2665_v36, %v2620_v21  ;;  %v668_v25 = vmul.f32 %v2665_v36, %v2633_v41 }
 0x402   :  { %v589_v7 = vpop.permute.xlu1 %588 }
 0x403   :  { %1767 = vmatmul.mubr.msk.f32.vlgmr.msra.gmra.mrb[4].mxu0 %vm258_vm1, %v589_v7 }
 0x404   :  { %2130 = vmatpush1.bf16.msra.mxu0 %v2570_v47  ;;  %878 = vmatprep.mubr.f32.mxu0 %v2452_v1 }
 0x405   :  { %2132 = vmatprep.subr.bf16.mxu0 %v2575_v50 }
 0x408   :  { %2134 = vmatpush1.bf16.msra.mxu0 %v2577_v53 }
 0x409   :  { %2136 = vmatprep.subr.bf16.mxu0 %v2581_v56 }
 0x40c   :  { %2138 = vmatpush1.bf16.msra.mxu0 %v2583_v59 }
 0x40d   :  { %2140 = vmatprep.subr.bf16.mxu0 %v2587_v62 }
 0x410   :  { %2142 = vmatpush1.bf16.msra.mxu0 %v2589_v3 }
 0x411   :  { %2160 = vmatprep.subr.bf16.mxu0 %v2568_v44 }
 0x413   :  { %v2663_v33 = vpop.permute.xlu1 %670 }
 0x414   :  { %v673_v8 = vmul.f32 %v2663_v33, %v2622_v22  ;;  %v674_v24 = vmul.f32 %v2663_v33, %v2635_v42 }
 0x416   :  { %v675_v11 = vadd.f32 %v673_v8, %v667_v10  ;;  %v676_v26 = vadd.f32 %v674_v24, %v668_v25  ;;  %v2461_v24 = vmov 73  }
 0x418   :  { %v677_v12 = vadd.f32 %v675_v11, %v2630_v27  ;;  %v678_v30 = vadd.f32 %v676_v26, %v2643_v49 }
 0x4d6   :  { %v658_v13 = vpop.f32.mrb[4].mxu0 }
 0x4d7   :  { %v679_v14 = vadd.f32 %v677_v12, %v658_v13  ;;  %v660_v16 = vpop.f32.mrb[5].mxu0 }
 0x4d8   :  { %v686_v28 = vadd.f32 %v660_v16, %v2641_v46 }
 0x4d9   :  { %v1768_v17 = vmul.f32 -1.442695, %v679_v14 }
 0x4db   :  { %2300 = vpow2.f32 %v1768_v17 }
 0x4e5   :  { %v2301_v18 = vpop.eup %2300 }
 0x4e6   :  { %v683_v20 = vadd.f32 1.0, %v2301_v18 }
 0x4e8   :  { %2302 = vrcp.f32 %v683_v20  ;;  %v2460_v20 = vmov 74  }
 0x4f2   :  { %v2303_v29 = vpop.eup %2302 }
 0x4f3   :  { %v687_v31 = vmul.f32 %v2303_v29, %v686_v28  ;;  %v690_v40 = vsub.f32 1.0, %v2303_v29  ;;  %v696_v45 = vmul.f32 %v2303_v29, %v586_v6 }
 0x4f5   :  { %v688_v32 = vadd.f32 %v687_v31, %v678_v30 }
 0x4f7   :  { %2304 = vtanh.f32 %v688_v32 }
 0x501   :  { %v2305_v34 = vpop.eup %2304 }
 0x502   :  { %692 = vrot.lane.b32.xlu1 %v2305_v34, %s2453_s2 }
 0x506   :  { %775 = vperm.xlu1 %2289, %v2542_v9  }
 0x50a   :  { %2292 = vset.pattern.permute.xlu1 %v2460_v20 }
 0x574   :  { %v693_v43 = vpop.permute.xlu1 %692 }
 0x575   :  { %v695_v48 = vmul.f32 %v693_v43, %v690_v40 }
 0x577   :  { %v697_v51 = vadd.f32 %v696_v45, %v695_v48 }
 0x579   :  { %699 = vrot.lane.b32.xlu0 %v697_v51, %s2453_s2 }
 0x57d   :  { %781 = vperm.xlu0 %2290, %v2542_v9  }
 0x581   :  { %2291 = vset.pattern.permute.xlu0 %v2461_v24 }
 0x582   :  { %886 = vperm.xlu0 %2291, %v2542_v9  }
 0x585   :  { %v2694_v55 = vpop.permute.xlu1 %775 }
 0x586   :  { %v778_v58 = vmul.f32 %v2694_v55, %v2620_v21  ;;  %v779_v10 = vmul.f32 %v2694_v55, %v2633_v41  ;;  %2293 = vset.pattern.permute.xlu0 %v2460_v20 }
 0x5eb   :  { %v700_v52 = vpop.permute.xlu0 %699 }
 0x5ec   :  { %1769 = vmatmul.mubr.msk.f32.vlgmr.msra.gmra.mrb[6].mxu1 %vm258_vm1, %v700_v52 }
 0x5ed   :  { %2146 = vmatpush1.bf16.msra.mxu1 %v2570_v47  ;;  %989 = vmatprep.mubr.f32.mxu1 %v2452_v1 }
 0x5ee   :  { %2148 = vmatprep.subr.bf16.mxu1 %v2575_v50 }
 0x5f1   :  { %2150 = vmatpush1.bf16.msra.mxu1 %v2577_v53 }
 0x5f2   :  { %2152 = vmatprep.subr.bf16.mxu1 %v2581_v56 }
 0x5f5   :  { %2154 = vmatpush1.bf16.msra.mxu1 %v2583_v59 }
 0x5f6   :  { %2156 = vmatprep.subr.bf16.mxu1 %v2587_v62 }
 0x5f9   :  { %2158 = vmatpush1.bf16.msra.mxu1 %v2589_v3 }
 0x5fa   :  { %2176 = vmatprep.subr.bf16.mxu1 %v2568_v44 }
 0x5fc   :  { %v2692_v54 = vpop.permute.xlu0 %781 }
 0x5fd   :  { %v784_v57 = vmul.f32 %v2692_v54, %v2622_v22  ;;  %v785_v8 = vmul.f32 %v2692_v54, %v2635_v42 }
 0x5ff   :  { %v786_v60 = vadd.f32 %v784_v57, %v778_v58  ;;  %v787_v11 = vadd.f32 %v785_v8, %v779_v10 }
 0x601   :  { %v788_v61 = vadd.f32 %v786_v60, %v2630_v27  ;;  %v789_v14 = vadd.f32 %v787_v11, %v2643_v49 }
 0x6bf   :  { %v769_v63 = vpop.f32.mrb[6].mxu1 }
 0x6c0   :  { %v790_v2 = vadd.f32 %v788_v61, %v769_v63  ;;  %v771_v4 = vpop.f32.mrb[7].mxu1 }
 0x6c1   :  { %v797_v12 = vadd.f32 %v771_v4, %v2641_v46 }
 0x6c2   :  { %v1770_v5 = vmul.f32 -1.442695, %v790_v2 }
 0x6c4   :  { %2306 = vpow2.f32 %v1770_v5 }
 0x6ce   :  { %v2307_v6 = vpop.eup %2306 }
 0x6cf   :  { %v794_v7 = vadd.f32 1.0, %v2307_v6 }
 0x6d1   :  { %2308 = vrcp.f32 %v794_v7 }
 0x6db   :  { %v2309_v13 = vpop.eup %2308 }
 0x6dc   :  { %v798_v16 = vmul.f32 %v2309_v13, %v797_v12  ;;  %v801_v25 = vsub.f32 1.0, %v2309_v13  ;;  %v807_v28 = vmul.f32 %v2309_v13, %v697_v51 }
 0x6de   :  { %v799_v17 = vadd.f32 %v798_v16, %v789_v14 }
 0x6e0   :  { %2310 = vtanh.f32 %v799_v17 }
 0x6ea   :  { %v2311_v18 = vpop.eup %2310 }
 0x6eb   :  { %803 = vrot.lane.b32.xlu1 %v2311_v18, %s2453_s2 }
 0x75d   :  { %v804_v26 = vpop.permute.xlu1 %803 }
 0x75e   :  { %v806_v29 = vmul.f32 %v804_v26, %v801_v25 }
 0x760   :  { %v808_v30 = vadd.f32 %v807_v28, %v806_v29 }
 0x762   :  { %810 = vrot.lane.b32.xlu1 %v808_v30, %s2453_s2 }
 0x766   :  { %892 = vperm.xlu1 %2292, %v2542_v9   ;;  %v887_v9 = vpop.permute.xlu0 %886 }
 0x767   :  { %v889_v34 = vmul.f32 %v887_v9, %v2620_v21  ;;  %v890_v58 = vmul.f32 %v887_v9, %v2633_v41  ;;  %v998_v14 = vmul.f32 %v887_v9, %v2622_v22 }
 0x7d4   :  { %v811_v31 = vpop.permute.xlu1 %810 }
 0x7d5   :  { %1771 = vmatmul.mubr.msk.f32.vlgmr.msra.gmra.mrb[6].mxu0 %vm258_vm1, %v811_v31 }
 0x7d6   :  { %2162 = vmatpush1.bf16.msra.mxu0 %v2570_v47  ;;  %1092 = vmatprep.mubr.f32.mxu0 %v2452_v1 }
 0x7d7   :  { %2164 = vmatprep.subr.bf16.mxu0 %v2575_v50 }
 0x7da   :  { %2166 = vmatpush1.bf16.msra.mxu0 %v2577_v53 }
 0x7db   :  { %2168 = vmatprep.subr.bf16.mxu0 %v2581_v56 }
 0x7de   :  { %2170 = vmatpush1.bf16.msra.mxu0 %v2583_v59 }
 0x7df   :  { %2172 = vmatprep.subr.bf16.mxu0 %v2587_v62 }
 0x7e2   :  { %2174 = vmatpush1.bf16.msra.mxu0 %v2589_v3 }
 0x7e3   :  { %2192 = vmatprep.subr.bf16.mxu0 %v2568_v44 }
 0x7e5   :  { %v893_v32 = vpop.permute.xlu1 %892 }
 0x7e6   :  { %v895_v35 = vmul.f32 %v893_v32, %v2622_v22  ;;  %v896_v44 = vmul.f32 %v893_v32, %v2635_v42  ;;  %v996_v16 = vmul.f32 %v893_v32, %v2620_v21  ;;  %v997_v31 = vmul.f32 %v893_v32, %v2633_v41 }
 0x7e7   :  { %v1099_v32 = vmul.f32 %v2692_v54, %v2620_v21 }
 0x7e8   :  { %v897_v39 = vadd.f32 %v895_v35, %v889_v34  ;;  %v898_v60 = vadd.f32 %v896_v44, %v890_v58  ;;  %v1000_v17 = vadd.f32 %v998_v14, %v996_v16 }
 0x7ea   :  { %v899_v40 = vadd.f32 %v897_v39, %v2630_v27  ;;  %v900_v2 = vadd.f32 %v898_v60, %v2643_v49  ;;  %v1002_v18 = vadd.f32 %v1000_v17, %v2630_v27  ;;  %v1202_v17 = vmul.f32 %v2663_v33, %v2620_v21 }
 0x8a8   :  { %v880_v43 = vpop.f32.mrb[6].mxu0 }
 0x8a9   :  { %v901_v45 = vadd.f32 %v899_v40, %v880_v43  ;;  %v882_v48 = vpop.f32.mrb[7].mxu0 }
 0x8aa   :  { %v908_v61 = vadd.f32 %v882_v48, %v2641_v46 }
 0x8ab   :  { %v1772_v51 = vmul.f32 -1.442695, %v901_v45 }
 0x8ad   :  { %2312 = vpow2.f32 %v1772_v51 }
 0x8b7   :  { %v2313_v52 = vpop.eup %2312 }
 0x8b8   :  { %v905_v57 = vadd.f32 1.0, %v2313_v52 }
 0x8ba   :  { %2314 = vrcp.f32 %v905_v57 }
 0x8c4   :  { %v2315_v63 = vpop.eup %2314 }
 0x8c5   :  { %v909_v4 = vmul.f32 %v2315_v63, %v908_v61  ;;  %v912_v7 = vsub.f32 1.0, %v2315_v63  ;;  %v918_v10 = vmul.f32 %v2315_v63, %v808_v30  ;;  %v999_v30 = vmul.f32 %v887_v9, %v2635_v42 }
 0x8c7   :  { %v910_v5 = vadd.f32 %v909_v4, %v900_v2  ;;  %v1001_v34 = vadd.f32 %v999_v30, %v997_v31  ;;  %v1102_v2 = vmul.f32 %v2694_v55, %v2635_v42 }
 0x8c9   :  { %2316 = vtanh.f32 %v910_v5  ;;  %v1003_v40 = vadd.f32 %v1001_v34, %v2643_v49  ;;  %v1203_v34 = vmul.f32 %v2663_v33, %v2633_v41 }
 0x8d3   :  { %v2317_v6 = vpop.eup %2316 }
 0x8d4   :  { %914 = vrot.lane.b32.xlu1 %v2317_v6, %s2453_s2 }
 0x946   :  { %v915_v8 = vpop.permute.xlu1 %914 }
 0x947   :  { %v917_v11 = vmul.f32 %v915_v8, %v912_v7 }
 0x949   :  { %v919_v12 = vadd.f32 %v918_v10, %v917_v11 }
 0x94b   :  { %921 = vrot.lane.b32.xlu0 %v919_v12, %s2453_s2 }
 0x9bd   :  { %v922_v13 = vpop.permute.xlu0 %921 }
 0x9be   :  { %1773 = vmatmul.mubr.msk.f32.vlgmr.msra.gmra.mrb[8].mxu1 %vm258_vm1, %v922_v13 }
 0x9bf   :  { %2178 = vmatpush1.bf16.msra.mxu1 %v2570_v47  ;;  %1195 = vmatprep.mubr.f32.mxu1 %v2452_v1 }
 0x9c0   :  { %2180 = vmatprep.subr.bf16.mxu1 %v2575_v50 }
 0x9c3   :  { %2182 = vmatpush1.bf16.msra.mxu1 %v2577_v53 }
 0x9c4   :  { %2184 = vmatprep.subr.bf16.mxu1 %v2581_v56 }
 0x9c7   :  { %2186 = vmatpush1.bf16.msra.mxu1 %v2583_v59 }
 0x9c8   :  { %2188 = vmatprep.subr.bf16.mxu1 %v2587_v62 }
 0x9cb   :  { %2190 = vmatpush1.bf16.msra.mxu1 %v2589_v3 }
 0x9cc   :  { %2207 = vmatprep.subr.bf16.mxu1 %v2450_v0 }
 0xa91   :  { %v991_v20 = vpop.f32.mrb[8].mxu1 }
 0xa92   :  { %v1004_v24 = vadd.f32 %v1002_v18, %v991_v20  ;;  %v993_v25 = vpop.f32.mrb[9].mxu1  ;;  %v1204_v18 = vmul.f32 %v2665_v36, %v2622_v22 }
 0xa93   :  { %v1011_v35 = vadd.f32 %v993_v25, %v2641_v46 }
 0xa94   :  { %v1774_v26 = vmul.f32 -1.442695, %v1004_v24  ;;  %v1206_v20 = vadd.f32 %v1204_v18, %v1202_v17  ;;  %v1422_v18 = vld [vmem:[#allocation7 + $0x130] sm:$0xff] }
 0xa96   :  { %2318 = vpow2.f32 %v1774_v26  ;;  %v1208_v24 = vadd.f32 %v1206_v20, %v2630_v27 }
 0xaa0   :  { %v2319_v28 = vpop.eup %2318 }
 0xaa1   :  { %v1008_v29 = vadd.f32 1.0, %v2319_v28 }
 0xaa3   :  { %2320 = vrcp.f32 %v1008_v29 }
 0xaad   :  { %v2321_v39 = vpop.eup %2320 }
 0xaae   :  { %v1012_v43 = vmul.f32 %v2321_v39, %v1011_v35  ;;  %v1015_v51 = vsub.f32 1.0, %v2321_v39  ;;  %v1021_v57 = vmul.f32 %v2321_v39, %v919_v12  ;;  %v1205_v35 = vmul.f32 %v2665_v36, %v2635_v42 }
 0xab0   :  { %v1013_v45 = vadd.f32 %v1012_v43, %v1003_v40  ;;  %v1207_v39 = vadd.f32 %v1205_v35, %v1203_v34 }
 0xab2   :  { %2322 = vtanh.f32 %v1013_v45  ;;  %v1209_v45 = vadd.f32 %v1207_v39, %v2643_v49 }
 0xabc   :  { %v2323_v48 = vpop.eup %2322 }
 0xabd   :  { %1017 = vrot.lane.b32.xlu1 %v2323_v48, %s2453_s2 }
 0xb2f   :  { %v1018_v52 = vpop.permute.xlu1 %1017 }
 0xb30   :  { %v1020_v58 = vmul.f32 %v1018_v52, %v1015_v51 }
 0xb32   :  { %v1022_v44 = vadd.f32 %v1021_v57, %v1020_v58 }
 0xb34   :  { %1024 = vrot.lane.b32.xlu0 %v1022_v44, %s2453_s2 }
 0xba6   :  { %v1025_v9 = vpop.permute.xlu0 %1024 }
 0xba7   :  { %1775 = vmatmul.mubr.msk.f32.vlgmr.msra.gmra.mrb[8].mxu0 %vm258_vm1, %v1025_v9 }
 0xba8   :  { %2194 = vmatpush1.bf16.msra.mxu0 %v2570_v47  ;;  %1298 = vmatprep.mubr.f32.mxu0 %v2452_v1  ;;  %v1101_v47 = vmul.f32 %v2694_v55, %v2622_v22 }
 0xba9   :  { %2196 = vmatprep.subr.bf16.mxu0 %v2575_v50 }
 0xbaa   :  { %v1103_v60 = vadd.f32 %v1101_v47, %v1099_v32  ;;  %v1307_v32 = vmul.f32 %v2622_v22, %v2616_v15  ;;  %v1305_v47 = vmul.f32 %v2624_v23, %v2620_v21  ;;  %v1306_v22 = vmul.f32 %v2624_v23, %v2633_v41  ;;  %v1337_v23 = vld [vmem:[#allocation7 + $0xd0] sm:$0xff] }
 0xbac   :  { %2198 = vmatpush1.bf16.msra.mxu0 %v2577_v53  ;;  %v1105_v50 = vadd.f32 %v1103_v60, %v2630_v27  ;;  %v1309_v60 = vadd.f32 %v1307_v32, %v1305_v47  ;;  %v1434_v32 = vld [vmem:[#allocation7 + $0x1f0] sm:$0xff] }
 0xbad   :  { %2200 = vmatprep.subr.bf16.mxu0 %v2581_v56 }
 0xbb0   :  { %2202 = vmatpush1.bf16.msra.mxu0 %v2583_v59 }
 0xbb1   :  { %2204 = vmatprep.subr.bf16.mxu0 %v2587_v62 }
 0xbb4   :  { %2206 = vmatpush1.bf16.msra.mxu0 %v2589_v3  ;;  %v1100_v3 = vmul.f32 %v2692_v54, %v2633_v41 }
 0xbb5   :  { %2219 = vmatprep.subr.bf16.mxu0 %v2450_v0 }
 0xbb6   :  { %v1104_v4 = vadd.f32 %v1102_v2, %v1100_v3  ;;  %v1308_v3 = vmul.f32 %v2635_v42, %v2616_v15  ;;  %v1336_v15 = vld [vmem:[#allocation7 + $0xc0] sm:$0xff] }
 0xbb7   :  { %v2214_v41 = vpack.c.bf16 %v1337_v23, %v1336_v15 }
 0xbb8   :  { %v1106_v7 = vadd.f32 %v1104_v4, %v2643_v49  ;;  %v1310_v2 = vadd.f32 %v1308_v3, %v1306_v22 }
 0xc7a   :  { %v1094_v53 = vpop.f32.mrb[8].mxu0 }
 0xc7b   :  { %v1107_v61 = vadd.f32 %v1105_v50, %v1094_v53  ;;  %v1096_v56 = vpop.f32.mrb[9].mxu0  ;;  %v1311_v50 = vadd.f32 %v1309_v60, %v2630_v27  ;;  %v1312_v27 = vadd.f32 %v1310_v2, %v2643_v49  ;;  %v1339_v49 = vld [vmem:[#allocation7 + $0xf0] sm:$0xff]  ;;  %v1507_v60 = vld [vmem:[#allocation7 + $0x200] sm:$0xff] }
 0xc7c   :  { %v1114_v5 = vadd.f32 %v1096_v56, %v2641_v46  ;;  %v1416_v2 = vld [vmem:[#allocation7 + $0x390] ss:$0 sm:$0xff] }
 0xc7d   :  { %v1776_v63 = vmul.f32 -1.442695, %v1107_v61 }
 0xc7f   :  { %2324 = vpow2.f32 %v1776_v63 }
 0xc89   :  { %v2325_v59 = vpop.eup %2324 }
 0xc8a   :  { %v1111_v62 = vadd.f32 1.0, %v2325_v59 }
 0xc8c   :  { %2326 = vrcp.f32 %v1111_v62 }
 0xc96   :  { %v2327_v6 = vpop.eup %2326 }
 0xc97   :  { %v1115_v8 = vmul.f32 %v2327_v6, %v1114_v5  ;;  %v1118_v12 = vsub.f32 1.0, %v2327_v6  ;;  %v1124_v14 = vmul.f32 %v2327_v6, %v1022_v44 }
 0xc99   :  { %v1116_v10 = vadd.f32 %v1115_v8, %v1106_v7  ;;  %v1332_v7 = vld [vmem:[#allocation7 + $0x80] sm:$0xff]  ;;  %v1333_v8 = vld [vmem:[#allocation7 + $0x90] sm:$0xff] }
 0xc9b   :  { %2328 = vtanh.f32 %v1116_v10  ;;  %v1334_v10 = vld [vmem:[#allocation7 + $0xa0] sm:$0xff] }
 0xca5   :  { %v2329_v11 = vpop.eup %2328 }
 0xca6   :  { %1120 = vrot.lane.b32.xlu1 %v2329_v11, %s2453_s2  ;;  %v2208_v11 = vpack.c.bf16 %v1333_v8, %v1332_v7  ;;  %v1514_v7 = vld [vmem:[#allocation7 + $0x270] sm:$0xff] }
 0xd18   :  { %v1121_v13 = vpop.permute.xlu1 %1120 }
 0xd19   :  { %v1123_v16 = vmul.f32 %v1121_v13, %v1118_v12  ;;  %v1335_v12 = vld [vmem:[#allocation7 + $0xb0] sm:$0xff] }
 0xd1a   :  { %v2211_v13 = vpack.c.bf16 %v1335_v12, %v1334_v10  ;;  %v1435_v10 = vld [vmem:[#allocation7 + $0x391] ss:$0 sm:$0xff] }
 0xd1b   :  { %v1125_v54 = vadd.f32 %v1124_v14, %v1123_v16  ;;  %v1419_v16 = vld [vmem:[#allocation7 + $0x100] sm:$0xff] }
 0xd1d   :  { %1127 = vrot.lane.b32.xlu0 %v1125_v54, %s2453_s2 }
 0xd8f   :  { %v1128_v55 = vpop.permute.xlu0 %1127 }
 0xd90   :  { %1777 = vmatmul.mubr.msk.f32.vlgmr.msra.gmra.mrb[10].mxu1 %vm258_vm1, %v1128_v55  ;;  %v1421_v55 = vld [vmem:[#allocation7 + $0x120] sm:$0xff] }
 0xd91   :  { %1937 = vmatprep.mubr.msk.f32.mxu1 %vm2451_vm0, %v2452_v1  ;;  %2209 = vmatpush3.bf16.msra.mxu1 %v2208_v11  ;;  %v2223_v20 = vpack.c.bf16 %v1422_v18, %v1421_v55  ;;  %v1662_v18 = vld [vmem:[#allocation7 + $0x350] sm:$0xff] }
 0xd92   :  { %2210 = vmatprep.subr.bf16.mxu1 %v2450_v0 }
 0xd95   :  { %2212 = vmatpush3.bf16.msra.mxu1 %v2211_v13 }
 0xd96   :  { %2213 = vmatprep.subr.bf16.mxu1 %v2450_v0 }
 0xd99   :  { %2215 = vmatpush3.bf16.msra.mxu1 %v2214_v41 }
 0xd9a   :  { %2216 = vmatprep.subr.bf16.mxu1 %v2450_v0 }
 0xe63   :  { %v1197_v25 = vpop.f32.mrb[10].mxu1 }
 0xe64   :  { %v1210_v26 = vadd.f32 %v1208_v24, %v1197_v25  ;;  %v1199_v28 = vpop.f32.mrb[11].mxu1  ;;  %v1423_v24 = vld [vmem:[#allocation7 + $0x140] sm:$0xff]  ;;  %v1424_v25 = vld [vmem:[#allocation7 + $0x150] sm:$0xff] }
 0xe65   :  { %v1217_v40 = vadd.f32 %v1199_v28, %v2641_v46  ;;  %v2226_v28 = vpack.c.bf16 %v1424_v25, %v1423_v24 }
 0xe66   :  { %v1778_v29 = vmul.f32 -1.442695, %v1210_v26 }
 0xe68   :  { %2330 = vpow2.f32 %v1778_v29 }
 0xe72   :  { %v2331_v30 = vpop.eup %2330 }
 0xe73   :  { %v1214_v31 = vadd.f32 1.0, %v2331_v30  ;;  %v1425_v30 = vld [vmem:[#allocation7 + $0x160] sm:$0xff] }
 0xe75   :  { %2332 = vrcp.f32 %v1214_v31  ;;  %v1426_v31 = vld [vmem:[#allocation7 + $0x170] sm:$0xff] }
 0xe7f   :  { %v2333_v43 = vpop.eup %2332 }
 0xe80   :  { %v1218_v48 = vmul.f32 %v2333_v43, %v1217_v40  ;;  %v1221_v57 = vsub.f32 1.0, %v2333_v43  ;;  %v1227_v44 = vmul.f32 %v2333_v43, %v1125_v54  ;;  %v1420_v54 = vld [vmem:[#allocation7 + $0x110] sm:$0xff]  ;;  %v2229_v40 = vpack.c.bf16 %v1426_v31, %v1425_v30  ;;  %v1427_v43 = vld [vmem:[#allocation7 + $0x180] sm:$0xff] }
 0xe81   :  { %v2220_v17 = vpack.c.bf16 %v1420_v54, %v1419_v16 }
 0xe82   :  { %v1219_v51 = vadd.f32 %v1218_v48, %v1209_v45  ;;  %v1428_v45 = vld [vmem:[#allocation7 + $0x190] sm:$0xff] }
 0xe83   :  { %v2232_v48 = vpack.c.bf16 %v1428_v45, %v1427_v43 }
 0xe84   :  { %2334 = vtanh.f32 %v1219_v51  ;;  %v1429_v51 = vld [vmem:[#allocation7 + $0x1a0] sm:$0xff] }
 0xe8e   :  { %v2335_v52 = vpop.eup %2334 }
 0xe8f   :  { %1223 = vrot.lane.b32.xlu1 %v2335_v52, %s2453_s2  ;;  %v1430_v52 = vld [vmem:[#allocation7 + $0x1b0] sm:$0xff] }
 0xf01   :  { %v1224_v58 = vpop.permute.xlu1 %1223 }
 0xf02   :  { %v1226_v9 = vmul.f32 %v1224_v58, %v1221_v57  ;;  %v2235_v57 = vpack.c.bf16 %v1430_v52, %v1429_v51 }
 0xf04   :  { %v2787_v33 = vadd.f32 %v1227_v44, %v1226_v9  ;;  %v1431_v44 = vld [vmem:[#allocation7 + $0x1c0] sm:$0xff]  ;;  %v1432_v9 = vld [vmem:[#allocation7 + $0x1d0] sm:$0xff] }
 0xf06   :  { %1230 = vrot.lane.b32.xlu0 %v2787_v33, %s2453_s2 }
 0xf78   :  { %v1231_v36 = vpop.permute.xlu0 %1230 }
 0xf79   :  { %1779 = vmatmul.mubr.msk.f32.vlgmr.msra.gmra.mrb[10].mxu0 %vm258_vm1, %v1231_v36  ;;  %v1433_v36 = vld [vmem:[#allocation7 + $0x1e0] sm:$0xff] }
 0xf7a   :  { %1972 = vmatprep.mubr.msk.f32.mxu0 %vm2451_vm0, %v2452_v1  ;;  %2221 = vmatpush3.bf16.msra.mxu0 %v2220_v17  ;;  %v2241_v47 = vpack.c.bf16 %v1434_v32, %v1433_v36 }
 0xf7b   :  { %2222 = vmatprep.subr.bf16.mxu0 %v2450_v0 }
 0xf7e   :  { %2224 = vmatpush3.bf16.msra.mxu0 %v2223_v20  ;;  %v1663_v20 = vld [vmem:[#allocation7 + $0x360] sm:$0xff] }
 0xf7f   :  { %2225 = vmatprep.subr.bf16.mxu0 %v2450_v0 }
 0xf82   :  { %2227 = vmatpush3.bf16.msra.mxu0 %v2226_v28 }
 0xf83   :  { %2228 = vmatprep.subr.bf16.mxu0 %v2450_v0 }
 0xf86   :  { %2230 = vmatpush3.bf16.msra.mxu0 %v2229_v40 }
 0xf87   :  { %2231 = vmatprep.subr.bf16.mxu0 %v2450_v0 }
 0xf8a   :  { %2233 = vmatpush3.bf16.msra.mxu0 %v2232_v48  ;;  %v2348_v48 = vld [vmem:[#allocation2] sm:$0xff] }
 0xf8b   :  { %2234 = vmatprep.subr.bf16.mxu0 %v2450_v0 }
 0xf8e   :  { %2236 = vmatpush3.bf16.msra.mxu0 %v2235_v57 }
 0xf8f   :  { %2237 = vmatprep.subr.bf16.mxu0 %v2450_v0 }
0x104c   :  { %v1300_v53 = vpop.f32.mrb[10].mxu0 }
0x104d   :  { %v1313_v61 = vadd.f32 %v1311_v50, %v1300_v53  ;;  %v1302_v56 = vpop.f32.mrb[11].mxu0  ;;  %v1508_v50 = vld [vmem:[#allocation7 + $0x210] sm:$0xff]  ;;  %v1509_v53 = vld [vmem:[#allocation7 + $0x220] sm:$0xff] }
0x104e   :  { %v1320_v21 = vadd.f32 %v1302_v56, %v2641_v46  ;;  %v1338_v46 = vld [vmem:[#allocation7 + $0xe0] sm:$0xff]  ;;  %v1510_v56 = vld [vmem:[#allocation7 + $0x230] sm:$0xff] }
0x104f   :  { %v1780_v63 = vmul.f32 -1.442695, %v1313_v61  ;;  %v2217_v14 = vpack.c.bf16 %v1339_v49, %v1338_v46  ;;  %v2244_v61 = vpack.c.bf16 %v1508_v50, %v1507_v60 }
0x1051   :  { %2336 = vpow2.f32 %v1780_v63  ;;  %2218 = vmatpush3.bf16.msra.mxu1 %v2217_v14  ;;  %v2247_v63 = vpack.c.bf16 %v1510_v56, %v1509_v53  ;;  %v337_v14 = vld [vmem:[#allocation7 + $0x387] ss:$0 sm:$0xff] }
0x1052   :  { %2243 = vmatprep.subr.bf16.mxu1 %v2450_v0  ;;  %v409_v16 = vadd.f32 %v2618_v19, %v337_v14  ;;  %v1661_v19 = vld [vmem:[#allocation7 + $0x340] sm:$0xff] }
0x1053   :  { %v2256_v25 = vpack.c.bf16 %v1662_v18, %v1661_v19 }
0x1054   :  { %v1589_v54 = vsub.f32 0.0, %v409_v16 }
0x1056   :  { %v1590_v17 = vmul.f32 1.442695, %v1589_v54 }
0x105b   :  { %v2337_v59 = vpop.eup %2336 }
0x105c   :  { %v1317_v62 = vadd.f32 1.0, %v2337_v59  ;;  %v1511_v59 = vld [vmem:[#allocation7 + $0x240] sm:$0xff] }
0x105e   :  { %2338 = vrcp.f32 %v1317_v62  ;;  %v1512_v62 = vld [vmem:[#allocation7 + $0x250] sm:$0xff] }
0x105f   :  { %v2250_v3 = vpack.c.bf16 %v1512_v62, %v1511_v59 }
0x1068   :  { %v2339_v4 = vpop.eup %2338 }
0x1069   :  { %v1321_v5 = vmul.f32 %v2339_v4, %v1320_v21  ;;  %v1324_v26 = vsub.f32 1.0, %v2339_v4  ;;  %v1330_v34 = vmul.f32 %v2339_v4, %v2787_v33  ;;  %v2238_v33 = vpack.c.bf16 %v1432_v9, %v1431_v44 }
0x106b   :  { %v1322_v6 = vadd.f32 %v1321_v5, %v1312_v27  ;;  %2239 = vmatpush3.bf16.msra.mxu0 %v2238_v33 }
0x106c   :  { %2240 = vmatprep.subr.bf16.mxu0 %v2450_v0 }
0x106d   :  { %2340 = vtanh.f32 %v1322_v6  ;;  %v1513_v6 = vld [vmem:[#allocation7 + $0x260] sm:$0xff] }
0x106e   :  { %v2253_v8 = vpack.c.bf16 %v1514_v7, %v1513_v6 }
0x106f   :  { %2242 = vmatpush3.bf16.msra.mxu0 %v2241_v47 }
0x1077   :  { %v2341_v42 = vpop.eup %2340 }
0x1078   :  { %1326 = vrot.lane.b32.xlu1 %v2341_v42, %s2453_s2 }
0x10ea   :  { %v1327_v29 = vpop.permute.xlu1 %1326 }
0x10eb   :  { %v1329_v35 = vmul.f32 %v1327_v29, %v1324_v26  ;;  %v1664_v26 = vld [vmem:[#allocation7 + $0x370] sm:$0xff] }
0x10ec   :  { %v2259_v30 = vpack.c.bf16 %v1664_v26, %v1663_v20 }
0x10ed   :  { %v1331_v39 = vadd.f32 %v1330_v34, %v1329_v35 }
0x10ef   :  { %1341 = vrot.lane.b32.xlu0 %v1331_v39, %s2453_s2 }
0x1161   :  { %v1342_v58 = vpop.permute.xlu0 %1341 }
0x1162   :  { %1938 = vmatmul.mubr.msk.f32.vlgmr.msra.gmra.mrb[12].mxu1 %vm258_vm1, %v1342_v58 }
0x1163   :  { %1991 = vmatprep.mubr.msk.f32.mxu1 %vm2451_vm0, %v2452_v1  ;;  %2245 = vmatpush3.bf16.msra.mxu1 %v2244_v61 }
0x1164   :  { %2246 = vmatprep.subr.bf16.mxu1 %v2450_v0 }
0x1167   :  { %2248 = vmatpush3.bf16.msra.mxu1 %v2247_v63 }
0x1168   :  { %2249 = vmatprep.subr.bf16.mxu1 %v2450_v0 }
0x116b   :  { %2251 = vmatpush3.bf16.msra.mxu1 %v2250_v3 }
0x116c   :  { %2252 = vmatprep.subr.bf16.mxu1 %v2450_v0 }
0x116f   :  { %2254 = vmatpush3.bf16.msra.mxu1 %v2253_v8 }
0x1170   :  { %2255 = vmatprep.subr.bf16.mxu1 %v2450_v0 }
0x1235   :  { %v1411_v22 = vpop.f32.mrb[12].mxu1 }
0x1236   :  { %v1415_v21 = vadd.f32 %v1411_v22, %v2564_v37  ;;  %v1939_v4 = vpop.f32.mrb[13].mxu1  ;;  %v1515_v37 = vld [vmem:[#allocation7 + $0x392] ss:$0 sm:$0xff] }
0x1238   :  { %v1417_v27 = vadd.f32 %v1416_v2, %v1415_v21  ;;  %v1739_v2 = vld [vmem:[#allocation7 + $0x393] ss:$0 sm:$0xff] }
0x123a   :  { %v1418_v5 = vmax.f32 %v1417_v27, 0.0 }
0x123c   :  { %1973 = vmatmul.mubr.f32.vlgmr.msra.gmra.mrb[12].mxu0 %v1418_v5 }
0x130f   :  { %v1502_v11 = vpop.f32.mrb[12].mxu0 }
0x1310   :  { %v1503_v12 = vadd.f32 %v1502_v11, %v1435_v10  ;;  %v1974_v13 = vpop.f32.mrb[13].mxu0 }
0x1312   :  { %v1506_v15 = vmax.f32 %v1503_v12, 0.0 }
0x1314   :  { %1992 = vmatmul.mubr.msk.f32.vlgmr.msra.gmra.mrb[14].mxu1 %vm258_vm1, %v1506_v15 }
0x1315   :  { %2002 = vmatprep.mubr.msk.f32.mxu1 %vm2451_vm0, %v2452_v1  ;;  %2257 = vmatpush3.bf16.msra.mxu1 %v2256_v25 }
0x1316   :  { %2258 = vmatprep.subr.bf16.mxu1 %v2450_v0 }
0x1319   :  { %2260 = vmatpush3.bf16.msra.mxu1 %v2259_v30 }
0x13e7   :  { %v1585_v23 = vpop.f32.mrb[14].mxu1 }
0x13e8   :  { %v1586_v41 = vadd.f32 %v1585_v23, %v1515_v37  ;;  %v1993_v42 = vpop.f32.mrb[15].mxu1 }
0x13ea   :  { %v1620_v46 = vmul.f32 0.5, %v1586_v41  ;;  %v1595_v43 = vsub.f32 %v409_v16, %v1586_v41  ;;  %v1592_v58 = vmul.f32 1.442695, %v1586_v41 }
0x13ec   :  { %v1621_v49 = vmul.f32 1.442695, %v1620_v46  ;;  %v1596_v57 = vmul.f32 %v1595_v43, %v1595_v43 }
0x13ee   :  { %2342 = vpow2.f32 %v1621_v49 }
0x13ef   :  { %2344 = vpow2.f32 %v1590_v17 }
0x13f0   :  { %2346 = vpow2.f32 %v1592_v58 }
0x13f8   :  { %v2343_v55 = vpop.eup %2342 }
0x13f9   :  { %1642 = vrot.lane.b32.xlu0 %v2343_v55, %s2462_s28  ;;  %1639 = vrot.lane.b32.xlu1 %v2343_v55, %s2463_s29  ;;  %v2345_v1 = vpop.eup %2344 }
0x13fa   :  { %v2347_v36 = vpop.eup %2346 }
0x13fb   :  { %v1594_v50 = vmul.f32 %v2347_v36, %v2345_v1 }
0x13fd   :  { %1645 = vrot.lane.b32.xlu1 %v2343_v55, %s2449_s24 }
0x1401   :  { %1624 = vrot.lane.b32.xlu1 %v1586_v41, %s2462_s28 }
0x1405   :  { %1630 = vrot.lane.b32.xlu1 %v1586_v41, %s2445_s26  ;;  %s2464_s26 = smov 32  }
0x1409   :  { %1598 = vrot.lane.b32.xlu1 %v2345_v1, %s2463_s29 }
0x146b   :  { %v1640_v24 = vpop.permute.xlu1 %1639  ;;  %v1643_v28 = vpop.permute.xlu0 %1642 }
0x146c   :  { %v1648_v29 = vsel %vm1614_vm3, %v1640_v24, %v2343_v55 }
0x146d   :  { %v1649_v34 = vsel %vm1634_vm4, %v1648_v29, %v1643_v28 }
0x146f   :  { %v1646_v31 = vpop.permute.xlu1 %1645 }
0x1470   :  { %v1650_v35 = vsel %vm1636_vm5, %v1649_v34, %v1646_v31 }
0x1471   :  { %1652 = vrot.lane.b32.xlu0 %v1650_v35, %s2464_s26 }
0x1473   :  { %v1625_v39 = vpop.permute.xlu1 %1624 }
0x1474   :  { %v1633_v9 = vsel %vm1614_vm3, %v1586_v41, %v1625_v39 }
0x1475   :  { %1627 = vrot.lane.b32.xlu0 %v1586_v41, %s2449_s24 }
0x1477   :  { %v1631_v40 = vpop.permute.xlu1 %1630 }
0x147b   :  { %v1599_v52 = vpop.permute.xlu1 %1598 }
0x147c   :  { %v1601_v0 = vmul.f32 %v1599_v52, %v1596_v57 }
0x14e3   :  { %v1653_v45 = vpop.permute.xlu0 %1652 }
0x14e4   :  { %v1655_v51 = vmul.f32 %v2348_v48, %v1653_v45 }
0x14e6   :  { %1657 = vrot.lane.b32.xlu0 %v1655_v51, %s2465_s30 }
0x14e7   :  { %v1628_v44 = vpop.permute.xlu0 %1627 }
0x14e8   :  { %v1635_v33 = vsel %vm1634_vm4, %v1633_v9, %v1628_v44 }
0x14e9   :  { %v1637_v47 = vsel %vm1636_vm5, %v1635_v33, %v1631_v40 }
0x14ea   :  { %1603 = vrot.lane.b32.xlu0 %v1601_v0, %s2462_s28 }
0x1558   :  { %v1658_v32 = vpop.permute.xlu0 %1657 }
0x1559   :  { %v1660_v60 = vadd.f32 %v1658_v32, %v1637_v47 }
0x155b   :  { %2003 = vmatmul.mubr.msk.f32.vlgmr.msra.gmra.mrb[16].mxu1 %vm338_vm2, %v1660_v60 }
0x155c   :  { %v1604_v53 = vpop.permute.xlu0 %1603 }
0x155d   :  { %v1606_v61 = vadd.f32 %v1604_v53, %v1594_v50 }
0x155f   :  { %v1783_v56 = vadd.f32 -1.0, %v1606_v61 }
0x1561   :  { %v1608_v63 = vadd.f32 %v1783_v56, %v1595_v43 }
0x1563   :  { %v1609_v59 = vmul.f32 0.5, %v1608_v63 }
0x1565   :  { %1611 = vrot.lane.b32.xlu1 %v1609_v59, %s2463_s29 }
0x15d7   :  { %v1612_v62 = vpop.permute.xlu1 %1611 }
0x15d8   :  { %v1615_v3 = vsel %vm1614_vm3, %v1612_v62, 0.0 }
0x15d9   :  { %1616 = vadd.xlane.f32.xlu0 %v1615_v3 }
0x162e   :  { %v1734_v22 = vpop.f32.mrb[16].mxu1 }
0x162f   :  { %v1738_v21 = vadd.f32 %v1734_v22, %v2566_v38  ;;  %v2004_v4 = vpop.f32.mrb[17].mxu1 }
0x1631   :  { %v1740_v27 = vadd.f32 %v1739_v2, %v1738_v21 }
0x1633   :  { %v1741_v5 = vmax.f32 %v1740_v27, 0.0 }
0x1635   :  { %1742 = vst [vmem:[#allocation8] sm:$0xff] %v1741_v5 }
0x1636   :  { %2426 = shalt.err (!%p2423_p0)
}
0x1637   :  { %s2427_s10 = scalar_lea.hbm %s2868_s3, 128 }
0x1638   :  { %p2428_p1 = scmp.ne.s32.totalorder %s2868_s3, %s2427_s10  ;;  %p2431_p2 = scmp.lt.u32.totalorder %s2427_s10, %s2868_s3 }
0x163a   :  { %p2433_p3 = pnand %p2431_p2, %p2428_p1 }
0x163c   :  { %2436 = shalt.err (!%p2433_p3)
}
0x163d   :  { %1752 = dma.vmem_to_hbm [thread:$0]  %s1750_s6, 128, %s2868_s3, [#allocation4]   ;;  %vm1618_vm6 = vcmask 7168  }
0x1666   :  { %v1617_v38 = vpop.xlane.xlu0 %1616 }
0x1667   :  { %1619 = vst.msk [vmem:[%s2869_s4] sm:$0xff] %vm1618_vm6, %v1617_v38 }
0x1668   :  { %2441 = dma.done.wait [#allocation4], 128  }
0x1669   :  { %2442 = vsyncadd [#allocation4], 4294967168 }
0x166a   :  { %1760 = vsyncpa [#allocation3], 1 }
0x166b   :  { %1761 = vsyncpa [#allocation6], 1 }
0x166c   :  { %1762 = vsyncpa [#allocation4], 1 }

</bundles_post_ra>
